<compile_context>
chip_gen: v7x
topology: tpu7x:2x2x1
jax: 0.10.0
libtpu: 0.0.40
codegen_flags: <defaults>
</compile_context>

<pallas_src>
import math
import functools

import jax
import jax.numpy as jnp
from jax.experimental import pallas as pl
from jax.experimental.pallas import tpu as pltpu

NEG_INF = -1.0e9  # numerically identical to float('-inf') for softmax (exp underflows to 0)


def _gelu_tanh(x):
    # TODO(synk): PyTorch nn.GELU() default is the exact erf-based GELU; Mosaic has no
    # erf lowering, so the tanh approximation is used (max abs error ~3e-4).
    c = math.sqrt(2.0 / math.pi)
    return 0.5 * x * (1.0 + jnp.tanh(c * (x + 0.044715 * x * x * x)))


def _layer_norm(v, w, b, eps=1e-5):
    mu = jnp.mean(v, axis=-1, keepdims=True)
    var = jnp.mean((v - mu) ** 2, axis=-1, keepdims=True)
    return (v - mu) * jax.lax.rsqrt(var + eps) * w + b


# ----------------------------------------------------------------------------- kernel
def encoder_transformer_kernel(
    x_ref, add_ref, mask_ref,
    wqkv_ref, bqkv_ref, wo_ref, bo_ref,
    ln1w_ref, ln1b_ref, w1_ref, b1_ref, w2_ref, b2_ref, ln2w_ref, ln2b_ref,
    wa1_ref, ba1_ref, wa2_ref, ba2_ref,
    eps_ref,
    out_ref,
    *, nhead, num_layers):
    M = x_ref.shape[0]                    # B*S rows, packed
    D = x_ref.shape[1]
    LAT = eps_ref.shape[1]
    hd = D // nhead
    scale = 1.0 / math.sqrt(hd)

    # pos-encoding + condition add is a precomputed per-row broadcast (wrapper).
    x = x_ref[...] + add_ref[...]          # (M, D)
    mask = mask_ref[...]                   # (M, M) combined additive mask (causal+pad+batch-block)

    # Hoisted loop invariants: per-head lane masks (computed once, reused in every layer).
    lane = jax.lax.broadcasted_iota(jnp.int32, (1, D), dimension=1)
    head_masks = [((lane >= h * hd) & (lane < (h + 1) * hd)).astype(jnp.float32)
                  for h in range(nhead)]

    for l in range(num_layers):            # post-norm TransformerEncoderLayer (norm_first=False)
        # Fused QKV projection: one (M, D) @ (D, 3D) matmul per layer.
        qkv = jnp.dot(x, wqkv_ref[l], preferred_element_type=jnp.float32) + bqkv_ref[l]
        q = qkv[:, 0:D]
        k = qkv[:, D:2 * D]
        v = qkv[:, 2 * D:3 * D]

        # Multi-head attention via per-head column masks (masked columns contribute
        # exact zeros, so results equal the per-head matmuls).  Cross-batch mixing is
        # removed by the block-diagonal additive mask.
        attn = jnp.zeros((M, D), jnp.float32)
        for h in range(nhead):
            hm = head_masks[h]
            s = jax.lax.dot_general(q * hm, k, (((1,), (1,)), ((), ())),
                                    preferred_element_type=jnp.float32) * scale
            s = s + mask
            mrow = jnp.max(s, axis=-1, keepdims=True)
            e = jnp.exp(s - mrow)
            p = e * pl.reciprocal(jnp.sum(e, axis=-1, keepdims=True), approx=True)
            attn = attn + jnp.dot(p, v * hm, preferred_element_type=jnp.float32)

        attn = jnp.dot(attn, wo_ref[l], preferred_element_type=jnp.float32) + bo_ref[l]
        x = _layer_norm(x + attn, ln1w_ref[l], ln1b_ref[l])

        h1 = jnp.dot(x, w1_ref[l], preferred_element_type=jnp.float32) + b1_ref[l]
        h1 = jnp.maximum(h1, 0.0)          # default TransformerEncoderLayer activation: relu
        ff = jnp.dot(h1, w2_ref[l], preferred_element_type=jnp.float32) + b2_ref[l]
        x = _layer_norm(x + ff, ln2w_ref[l], ln2b_ref[l])

    # activation_function head; the module applies the SAME Sequential to `hidden`
    # for both `mean` and `log_var`, so they are identical by construction and only
    # computed once here.
    g = jnp.dot(x, wa1_ref[...], preferred_element_type=jnp.float32) + ba1_ref[...]
    g = _gelu_tanh(g)
    mo = jnp.dot(g, wa2_ref[...], preferred_element_type=jnp.float32) + ba2_ref[...]

    std = jnp.exp(0.5 * mo)                # reparameterize
    z = eps_ref[...] * std + mo

    # Single lane-wider output block: [z | mean], split in the wrapper.
    out_ref[...] = jnp.concatenate([z, mo], axis=-1)


# ----------------------------------------------------------------------------- wrapper
def encoder_transformer_forward(x, pe_rows, cond, attn_mask, pad_mask_f, eps, params,
                                *, nhead, num_layers):
    B, S, D = x.shape
    L = num_layers
    F = 4 * D
    LAT = params["wa2"].shape[1]
    M = B * S

    # Fuse Q/K/V projection weights into one matmul per layer.
    wqkv = jnp.concatenate([params["wq"], params["wk"], params["wv"]], axis=-1)  # (L, D, 3D)
    bqkv = jnp.concatenate([params["bq"], params["bk"], params["bv"]], axis=-1)  # (L, 1, 3D)

    # Positional-encoding row + condition embedding, broadcast to every sequence
    # position of its batch element (one (M, D) add in-kernel).
    add_rows = jnp.repeat(pe_rows + cond, S, axis=0)                              # (B*S, D)

    # Combined additive attention mask over the packed (B*S) rows:
    #   same batch  -> causal mask + key padding
    #   cross batch -> -1e9 (exact zero probability after softmax)
    within = attn_mask[None, :, :] + pad_mask_f[:, None, :]                       # (B, S, S)
    same = jnp.arange(B)[:, None] == jnp.arange(B)[None, :]                       # (B, B)
    mask_full = jnp.where(same[:, None, :, None], within[:, :, None, :], NEG_INF)
    mask_full = mask_full.reshape(M, M).astype(jnp.float32)

    x2 = x.reshape(M, D)
    eps2 = eps.reshape(M, LAT)

    kernel = functools.partial(encoder_transformer_kernel,
                               nhead=nhead, num_layers=num_layers)

    def full(shape):
        return pl.BlockSpec(shape, lambda i: (0,) * len(shape))

    grid_spec = pltpu.PrefetchScalarGridSpec(
        num_scalar_prefetch=0,
        grid=(1,),
        in_specs=[
            full((M, D)),                      # x (B*S rows packed)
            full((M, D)),                      # pos-enc + condition add
            full((M, M)),                      # combined additive attention mask
            full((L, D, 3 * D)), full((L, 1, 3 * D)),   # fused wqkv, bqkv
            full((L, D, D)), full((L, 1, D)),           # wo, bo
            full((L, 1, D)), full((L, 1, D)),           # ln1 w, b
            full((L, D, F)), full((L, 1, F)),           # ffn w1, b1
            full((L, F, D)), full((L, 1, D)),           # ffn w2, b2
            full((L, 1, D)), full((L, 1, D)),           # ln2 w, b
            full((D, 2 * LAT)), full((1, 2 * LAT)),     # head linear1
            full((2 * LAT, LAT)), full((1, LAT)),       # head linear2
            full((M, LAT)),                             # eps
        ],
        out_specs=full((M, 2 * LAT)),
    )

    out = pl.pallas_call(
        kernel,
        out_shape=jax.ShapeDtypeStruct((M, 2 * LAT), jnp.float32),
        grid_spec=grid_spec,
        compiler_params=pltpu.CompilerParams(dimension_semantics=("parallel",)),
    )(x2, add_rows, mask_full, wqkv, bqkv,
      params["wo"], params["bo"],
      params["ln1w"], params["ln1b"], params["w1"], params["b1"],
      params["w2"], params["b2"], params["ln2w"], params["ln2b"],
      params["wa1"], params["ba1"], params["wa2"], params["ba2"],
      eps2)

    z = out[:, :LAT].reshape(B, S, LAT)
    mean = out[:, LAT:].reshape(B, S, LAT)
    log_var = mean            # module applies the same Sequential to `hidden` twice
    return z, log_var, mean


# ----------------------------------------------------------------------------- pure-JAX reference
def reference_forward(x, pe_rows, cond, attn_mask, pad_mask_f, eps, params,
                      *, nhead, num_layers):
    B, S, D = x.shape
    hd = D // nhead
    h = x + pe_rows[:, None, :] + cond[:, None, :]
    mask = attn_mask[None] + pad_mask_f[:, None, :]          # (B, S, S)
    for l in range(num_layers):
        q = h @ params["wq"][l] + params["bq"][l]
        k = h @ params["wk"][l] + params["bk"][l]
        v = h @ params["wv"][l] + params["bv"][l]
        q = q.reshape(B, S, nhead, hd).transpose(0, 2, 1, 3)
        k = k.reshape(B, S, nhead, hd).transpose(0, 2, 1, 3)
        v = v.reshape(B, S, nhead, hd).transpose(0, 2, 1, 3)
        s = jnp.einsum("bhqd,bhkd->bhqk", q, k) / math.sqrt(hd) + mask[:, None]
        p = jax.nn.softmax(s, axis=-1)
        a = jnp.einsum("bhqk,bhkd->bhqd", p, v).transpose(0, 2, 1, 3).reshape(B, S, D)
        a = a @ params["wo"][l] + params["bo"][l]
        h = _layer_norm(h + a, params["ln1w"][l], params["ln1b"][l])
        f = jnp.maximum(h @ params["w1"][l] + params["b1"][l], 0.0)
        f = f @ params["w2"][l] + params["b2"][l]
        h = _layer_norm(h + f, params["ln2w"][l], params["ln2b"][l])
    g = _gelu_tanh(h @ params["wa1"] + params["ba1"])
    mo = g @ params["wa2"] + params["ba2"]
    z = eps * jnp.exp(0.5 * mo) + mo
    return z, mo, mo


# ----------------------------------------------------------------------------- main
if __name__ == "__main__":
    B, S, D = 2, 8, 32              # batch, seq, input_size (d_model)
    NHEAD, LATENT, NUM_LAYERS = 4, 16, 2
    F = 4 * D

    key = jax.random.PRNGKey(0)
    keys = jax.random.split(key, 24)

    def w(k, shape, scl=0.05):
        return (scl * jax.random.normal(k, shape)).astype(jnp.float32)

    params = {
        "wq":   w(keys[0], (NUM_LAYERS, D, D)),
        "bq":   w(keys[1], (NUM_LAYERS, 1, D)),
        "wk":   w(keys[2], (NUM_LAYERS, D, D)),
        "bk":   w(keys[3], (NUM_LAYERS, 1, D)),
        "wv":   w(keys[4], (NUM_LAYERS, D, D)),
        "bv":   w(keys[5], (NUM_LAYERS, 1, D)),
        "wo":   w(keys[6], (NUM_LAYERS, D, D)),
        "bo":   w(keys[7], (NUM_LAYERS, 1, D)),
        "ln1w": jnp.ones((NUM_LAYERS, 1, D), jnp.float32),
        "ln1b": jnp.zeros((NUM_LAYERS, 1, D), jnp.float32),
        "w1":   w(keys[8], (NUM_LAYERS, D, F)),
        "b1":   w(keys[9], (NUM_LAYERS, 1, F)),
        "w2":   w(keys[10], (NUM_LAYERS, F, D)),
        "b2":   w(keys[11], (NUM_LAYERS, 1, D)),
        "ln2w": jnp.ones((NUM_LAYERS, 1, D), jnp.float32),
        "ln2b": jnp.zeros((NUM_LAYERS, 1, D), jnp.float32),
        "wa1":  w(keys[12], (D, 2 * LATENT)),
        "ba1":  w(keys[13], (1, 2 * LATENT)),
        "wa2":  w(keys[14], (2 * LATENT, LATENT)),
        "ba2":  w(keys[15], (1, LATENT)),
    }

    x = jax.random.normal(keys[16], (B, S, D), jnp.float32)           # input_embedding
    cond = 0.1 * jax.random.normal(keys[17], (B, D), jnp.float32)     # condition_embedding
    eps = jax.random.normal(keys[18], (B, S, LATENT), jnp.float32)    # reparameterize noise

    # timestamp is only used via its length (== batch size) in positionalEncoding.forward.
    timestamp = jnp.arange(B)
    # Positional-encoding buffer (same formula as the PyTorch module), rows [:len(timestamp)];
    # pe[:T] has shape (T, 1, D) and broadcasts along the batch dimension of [B, S, D].
    pos = jnp.arange(5000, dtype=jnp.float32)[:, None]
    div = jnp.exp(jnp.arange(0, D, 2, dtype=jnp.float32) * (-math.log(10000.0) / D))
    pe = jnp.zeros((5000, D), jnp.float32)
    pe = pe.at[:, 0::2].set(jnp.sin(pos * div))
    pe = pe.at[:, 1::2].set(jnp.cos(pos * div))
    pe_rows = pe[: timestamp.shape[0]]                                # (B, D)

    # src_mask: causal additive float mask (generate_square_subsequent_mask semantics).
    causal = jnp.where(jnp.tril(jnp.ones((S, S), jnp.float32)) == 1.0, 0.0, NEG_INF)
    causal = causal.astype(jnp.float32)
    # src_key_padding_mask: bool with True == padded key -> additive large-negative mask.
    pad_bool = jnp.zeros((B, S), bool).at[1, S - 1].set(True)
    pad_f = jnp.where(pad_bool, NEG_INF, 0.0).astype(jnp.float32)

    z, log_var, mean = encoder_transformer_forward(
        x, pe_rows, cond, causal, pad_f, eps, params,
        nhead=NHEAD, num_layers=NUM_LAYERS)
    jax.block_until_ready((z, log_var, mean))

    z_ref, lv_ref, m_ref = reference_forward(
        x, pe_rows, cond, causal, pad_f, eps, params,
        nhead=NHEAD, num_layers=NUM_LAYERS)

    assert bool(jnp.all(jnp.isfinite(z)))
    assert bool(jnp.allclose(z, z_ref, atol=2e-3, rtol=2e-3))
    assert bool(jnp.allclose(mean, m_ref, atol=2e-3, rtol=2e-3))
    assert bool(jnp.allclose(log_var, lv_ref, atol=2e-3, rtol=2e-3))
    print("KERNEL_OK")
</pallas_src>

<mosaic_0001>
module attributes {stable_mosaic.version = 11 : i64} {
  func.func @encoder_transformer_kernel(%arg0: i32, %arg1: memref<16x32xf32, #tpu.memory_space<vmem>>, %arg2: memref<16x32xf32, #tpu.memory_space<vmem>>, %arg3: memref<16x16xf32, #tpu.memory_space<vmem>>, %arg4: memref<2x32x96xf32, #tpu.memory_space<vmem>>, %arg5: memref<2x1x96xf32, #tpu.memory_space<vmem>>, %arg6: memref<2x32x32xf32, #tpu.memory_space<vmem>>, %arg7: memref<2x1x32xf32, #tpu.memory_space<vmem>>, %arg8: memref<2x1x32xf32, #tpu.memory_space<vmem>>, %arg9: memref<2x1x32xf32, #tpu.memory_space<vmem>>, %arg10: memref<2x32x128xf32, #tpu.memory_space<vmem>>, %arg11: memref<2x1x128xf32, #tpu.memory_space<vmem>>, %arg12: memref<2x128x32xf32, #tpu.memory_space<vmem>>, %arg13: memref<2x1x32xf32, #tpu.memory_space<vmem>>, %arg14: memref<2x1x32xf32, #tpu.memory_space<vmem>>, %arg15: memref<2x1x32xf32, #tpu.memory_space<vmem>>, %arg16: memref<32x32xf32, #tpu.memory_space<vmem>>, %arg17: memref<1x32xf32, #tpu.memory_space<vmem>>, %arg18: memref<32x16xf32, #tpu.memory_space<vmem>>, %arg19: memref<1x16xf32, #tpu.memory_space<vmem>>, %arg20: memref<16x16xf32, #tpu.memory_space<vmem>>, %arg21: memref<16x32xf32, #tpu.memory_space<vmem>>) attributes {dimension_semantics = [#tpu.dimension_semantics<parallel>], iteration_bounds = array<i64: 1>, scalar_prefetch = 0 : i64, scratch_operands = 0 : i64, tpu.core_type = #tpu.core_type<tc>, window_params = [{pipeline_mode = #tpu.pipeline_mode<synchronous>, transform_indices = @transform_0, window_bounds = array<i64: 16, 32>}, {pipeline_mode = #tpu.pipeline_mode<synchronous>, transform_indices = @transform_1, window_bounds = array<i64: 16, 32>}, {pipeline_mode = #tpu.pipeline_mode<synchronous>, transform_indices = @transform_2, window_bounds = array<i64: 16, 16>}, {pipeline_mode = #tpu.pipeline_mode<synchronous>, transform_indices = @transform_3, window_bounds = array<i64: 2, 32, 96>}, {pipeline_mode = #tpu.pipeline_mode<synchronous>, transform_indices = @transform_4, window_bounds = array<i64: 2, 1, 96>}, {pipeline_mode = #tpu.pipeline_mode<synchronous>, transform_indices = @transform_5, window_bounds = array<i64: 2, 32, 32>}, {pipeline_mode = #tpu.pipeline_mode<synchronous>, transform_indices = @transform_6, window_bounds = array<i64: 2, 1, 32>}, {pipeline_mode = #tpu.pipeline_mode<synchronous>, transform_indices = @transform_7, window_bounds = array<i64: 2, 1, 32>}, {pipeline_mode = #tpu.pipeline_mode<synchronous>, transform_indices = @transform_8, window_bounds = array<i64: 2, 1, 32>}, {pipeline_mode = #tpu.pipeline_mode<synchronous>, transform_indices = @transform_9, window_bounds = array<i64: 2, 32, 128>}, {pipeline_mode = #tpu.pipeline_mode<synchronous>, transform_indices = @transform_10, window_bounds = array<i64: 2, 1, 128>}, {pipeline_mode = #tpu.pipeline_mode<synchronous>, transform_indices = @transform_11, window_bounds = array<i64: 2, 128, 32>}, {pipeline_mode = #tpu.pipeline_mode<synchronous>, transform_indices = @transform_12, window_bounds = array<i64: 2, 1, 32>}, {pipeline_mode = #tpu.pipeline_mode<synchronous>, transform_indices = @transform_13, window_bounds = array<i64: 2, 1, 32>}, {pipeline_mode = #tpu.pipeline_mode<synchronous>, transform_indices = @transform_14, window_bounds = array<i64: 2, 1, 32>}, {pipeline_mode = #tpu.pipeline_mode<synchronous>, transform_indices = @transform_15, window_bounds = array<i64: 32, 32>}, {pipeline_mode = #tpu.pipeline_mode<synchronous>, transform_indices = @transform_16, window_bounds = array<i64: 1, 32>}, {pipeline_mode = #tpu.pipeline_mode<synchronous>, transform_indices = @transform_17, window_bounds = array<i64: 32, 16>}, {pipeline_mode = #tpu.pipeline_mode<synchronous>, transform_indices = @transform_18, window_bounds = array<i64: 1, 16>}, {pipeline_mode = #tpu.pipeline_mode<synchronous>, transform_indices = @transform_19, window_bounds = array<i64: 16, 16>}, {pipeline_mode = #tpu.pipeline_mode<synchronous>, transform_indices = @transform_20, window_bounds = array<i64: 16, 32>}]} {
    %c0 = arith.constant 0 : index
    %c0_0 = arith.constant 0 : index
    %0 = vector.load %arg1[%c0, %c0_0] : memref<16x32xf32, #tpu.memory_space<vmem>>, vector<16x32xf32>
    %c0_1 = arith.constant 0 : index
    %c0_2 = arith.constant 0 : index
    %1 = vector.load %arg2[%c0_1, %c0_2] : memref<16x32xf32, #tpu.memory_space<vmem>>, vector<16x32xf32>
    %2 = arith.addf %0, %1 : vector<16x32xf32>
    %c0_3 = arith.constant 0 : index
    %c0_4 = arith.constant 0 : index
    %3 = vector.load %arg3[%c0_3, %c0_4] : memref<16x16xf32, #tpu.memory_space<vmem>>, vector<16x16xf32>
    %4 = tpu.iota {dimensions = array<i32: 1>} : vector<1x32xi32>
    %c0_i32 = arith.constant 0 : i32
    %5 = vector.broadcast %c0_i32 : i32 to vector<1x32xi32>
    %6 = arith.cmpi sge, %4, %5 : vector<1x32xi32>
    %c8_i32 = arith.constant 8 : i32
    %7 = vector.broadcast %c8_i32 : i32 to vector<1x32xi32>
    %8 = arith.cmpi slt, %4, %7 : vector<1x32xi32>
    %9 = arith.andi %6, %8 : vector<1x32xi1>
    %10 = arith.extui %9 : vector<1x32xi1> to vector<1x32xi32>
    %11 = arith.sitofp %10 : vector<1x32xi32> to vector<1x32xf32>
    %c8_i32_5 = arith.constant 8 : i32
    %12 = vector.broadcast %c8_i32_5 : i32 to vector<1x32xi32>
    %13 = arith.cmpi sge, %4, %12 : vector<1x32xi32>
    %c16_i32 = arith.constant 16 : i32
    %14 = vector.broadcast %c16_i32 : i32 to vector<1x32xi32>
    %15 = arith.cmpi slt, %4, %14 : vector<1x32xi32>
    %16 = arith.andi %13, %15 : vector<1x32xi1>
    %17 = arith.extui %16 : vector<1x32xi1> to vector<1x32xi32>
    %18 = arith.sitofp %17 : vector<1x32xi32> to vector<1x32xf32>
    %c16_i32_6 = arith.constant 16 : i32
    %19 = vector.broadcast %c16_i32_6 : i32 to vector<1x32xi32>
    %20 = arith.cmpi sge, %4, %19 : vector<1x32xi32>
    %c24_i32 = arith.constant 24 : i32
    %21 = vector.broadcast %c24_i32 : i32 to vector<1x32xi32>
    %22 = arith.cmpi slt, %4, %21 : vector<1x32xi32>
    %23 = arith.andi %20, %22 : vector<1x32xi1>
    %24 = arith.extui %23 : vector<1x32xi1> to vector<1x32xi32>
    %25 = arith.sitofp %24 : vector<1x32xi32> to vector<1x32xf32>
    %c24_i32_7 = arith.constant 24 : i32
    %26 = vector.broadcast %c24_i32_7 : i32 to vector<1x32xi32>
    %27 = arith.cmpi sge, %4, %26 : vector<1x32xi32>
    %c32_i32 = arith.constant 32 : i32
    %28 = vector.broadcast %c32_i32 : i32 to vector<1x32xi32>
    %29 = arith.cmpi slt, %4, %28 : vector<1x32xi32>
    %30 = arith.andi %27, %29 : vector<1x32xi1>
    %31 = arith.extui %30 : vector<1x32xi1> to vector<1x32xi32>
    %32 = arith.sitofp %31 : vector<1x32xi32> to vector<1x32xf32>
    %c0_8 = arith.constant 0 : index
    %c0_9 = arith.constant 0 : index
    %c0_10 = arith.constant 0 : index
    %33 = vector.load %arg4[%c0_8, %c0_9, %c0_10] : memref<2x32x96xf32, #tpu.memory_space<vmem>>, vector<1x32x96xf32>
    %34 = vector.shape_cast %33 : vector<1x32x96xf32> to vector<32x96xf32>
    %cst = arith.constant dense<0.000000e+00> : vector<16x96xf32>
    %35 = tpu.matmul %2, %34, %cst {dimension_numbers = #tpu.dot_dimension_numbers<[1], [0], [0], [1], [0, 0, 1, 1], [], []>} : vector<16x32xf32>, vector<32x96xf32>, vector<16x96xf32> -> vector<16x96xf32>
    %c0_11 = arith.constant 0 : index
    %c0_12 = arith.constant 0 : index
    %c0_13 = arith.constant 0 : index
    %36 = vector.load %arg5[%c0_11, %c0_12, %c0_13] : memref<2x1x96xf32, #tpu.memory_space<vmem>>, vector<1x1x96xf32>
    %37 = vector.shape_cast %36 : vector<1x1x96xf32> to vector<1x96xf32>
    %38 = vector.broadcast %37 : vector<1x96xf32> to vector<16x96xf32>
    %39 = arith.addf %35, %38 : vector<16x96xf32>
    %40 = vector.extract_strided_slice %39 {offsets = [0, 0], sizes = [16, 32], strides = [1, 1]} : vector<16x96xf32> to vector<16x32xf32>
    %41 = vector.extract_strided_slice %39 {offsets = [0, 32], sizes = [16, 32], strides = [1, 1]} : vector<16x96xf32> to vector<16x32xf32>
    %42 = vector.extract_strided_slice %39 {offsets = [0, 64], sizes = [16, 32], strides = [1, 1]} : vector<16x96xf32> to vector<16x32xf32>
    %cst_14 = arith.constant 0.000000e+00 : f32
    %43 = vector.broadcast %cst_14 : f32 to vector<16x32xf32>
    %44 = vector.broadcast %11 : vector<1x32xf32> to vector<16x32xf32>
    %45 = arith.mulf %40, %44 : vector<16x32xf32>
    %cst_15 = arith.constant dense<0.000000e+00> : vector<16x16xf32>
    %46 = tpu.matmul %45, %41, %cst_15 {dimension_numbers = #tpu.dot_dimension_numbers<[1], [1], [0], [0], [0, 0, 1, 0], [], []>} : vector<16x32xf32>, vector<16x32xf32>, vector<16x16xf32> -> vector<16x16xf32>
    %cst_16 = arith.constant 0.353553385 : f32
    %47 = vector.broadcast %cst_16 : f32 to vector<16x16xf32>
    %48 = arith.mulf %46, %47 : vector<16x16xf32>
    %49 = arith.addf %48, %3 : vector<16x16xf32>
    %cst_17 = arith.constant dense<0xFF800000> : vector<16xf32>
    %50 = vector.multi_reduction <maximumf>, %49, %cst_17 [1] : vector<16x16xf32> to vector<16xf32>
    %51 = vector.shape_cast %50 : vector<16xf32> to vector<16x1xf32>
    %52 = vector.broadcast %51 : vector<16x1xf32> to vector<16x16xf32>
    %53 = arith.subf %49, %52 : vector<16x16xf32>
    %54 = math.exp %53 : vector<16x16xf32>
    %cst_18 = arith.constant dense<0.000000e+00> : vector<16xf32>
    %55 = vector.multi_reduction <add>, %54, %cst_18 [1] : vector<16x16xf32> to vector<16xf32>
    %56 = vector.shape_cast %55 : vector<16xf32> to vector<16x1xf32>
    %57 = tpu.reciprocal %56 {approx = true} : vector<16x1xf32> -> vector<16x1xf32>
    %58 = vector.broadcast %57 : vector<16x1xf32> to vector<16x16xf32>
    %59 = arith.mulf %54, %58 : vector<16x16xf32>
    %60 = vector.broadcast %11 : vector<1x32xf32> to vector<16x32xf32>
    %61 = arith.mulf %42, %60 : vector<16x32xf32>
    %cst_19 = arith.constant dense<0.000000e+00> : vector<16x32xf32>
    %62 = tpu.matmul %59, %61, %cst_19 {dimension_numbers = #tpu.dot_dimension_numbers<[1], [0], [0], [1], [0, 0, 1, 1], [], []>} : vector<16x16xf32>, vector<16x32xf32>, vector<16x32xf32> -> vector<16x32xf32>
    %63 = arith.addf %43, %62 : vector<16x32xf32>
    %64 = vector.broadcast %18 : vector<1x32xf32> to vector<16x32xf32>
    %65 = arith.mulf %40, %64 : vector<16x32xf32>
    %cst_20 = arith.constant dense<0.000000e+00> : vector<16x16xf32>
    %66 = tpu.matmul %65, %41, %cst_20 {dimension_numbers = #tpu.dot_dimension_numbers<[1], [1], [0], [0], [0, 0, 1, 0], [], []>} : vector<16x32xf32>, vector<16x32xf32>, vector<16x16xf32> -> vector<16x16xf32>
    %cst_21 = arith.constant 0.353553385 : f32
    %67 = vector.broadcast %cst_21 : f32 to vector<16x16xf32>
    %68 = arith.mulf %66, %67 : vector<16x16xf32>
    %69 = arith.addf %68, %3 : vector<16x16xf32>
    %cst_22 = arith.constant dense<0xFF800000> : vector<16xf32>
    %70 = vector.multi_reduction <maximumf>, %69, %cst_22 [1] : vector<16x16xf32> to vector<16xf32>
    %71 = vector.shape_cast %70 : vector<16xf32> to vector<16x1xf32>
    %72 = vector.broadcast %71 : vector<16x1xf32> to vector<16x16xf32>
    %73 = arith.subf %69, %72 : vector<16x16xf32>
    %74 = math.exp %73 : vector<16x16xf32>
    %cst_23 = arith.constant dense<0.000000e+00> : vector<16xf32>
    %75 = vector.multi_reduction <add>, %74, %cst_23 [1] : vector<16x16xf32> to vector<16xf32>
    %76 = vector.shape_cast %75 : vector<16xf32> to vector<16x1xf32>
    %77 = tpu.reciprocal %76 {approx = true} : vector<16x1xf32> -> vector<16x1xf32>
    %78 = vector.broadcast %77 : vector<16x1xf32> to vector<16x16xf32>
    %79 = arith.mulf %74, %78 : vector<16x16xf32>
    %80 = vector.broadcast %18 : vector<1x32xf32> to vector<16x32xf32>
    %81 = arith.mulf %42, %80 : vector<16x32xf32>
    %cst_24 = arith.constant dense<0.000000e+00> : vector<16x32xf32>
    %82 = tpu.matmul %79, %81, %cst_24 {dimension_numbers = #tpu.dot_dimension_numbers<[1], [0], [0], [1], [0, 0, 1, 1], [], []>} : vector<16x16xf32>, vector<16x32xf32>, vector<16x32xf32> -> vector<16x32xf32>
    %83 = arith.addf %63, %82 : vector<16x32xf32>
    %84 = vector.broadcast %25 : vector<1x32xf32> to vector<16x32xf32>
    %85 = arith.mulf %40, %84 : vector<16x32xf32>
    %cst_25 = arith.constant dense<0.000000e+00> : vector<16x16xf32>
    %86 = tpu.matmul %85, %41, %cst_25 {dimension_numbers = #tpu.dot_dimension_numbers<[1], [1], [0], [0], [0, 0, 1, 0], [], []>} : vector<16x32xf32>, vector<16x32xf32>, vector<16x16xf32> -> vector<16x16xf32>
    %cst_26 = arith.constant 0.353553385 : f32
    %87 = vector.broadcast %cst_26 : f32 to vector<16x16xf32>
    %88 = arith.mulf %86, %87 : vector<16x16xf32>
    %89 = arith.addf %88, %3 : vector<16x16xf32>
    %cst_27 = arith.constant dense<0xFF800000> : vector<16xf32>
    %90 = vector.multi_reduction <maximumf>, %89, %cst_27 [1] : vector<16x16xf32> to vector<16xf32>
    %91 = vector.shape_cast %90 : vector<16xf32> to vector<16x1xf32>
    %92 = vector.broadcast %91 : vector<16x1xf32> to vector<16x16xf32>
    %93 = arith.subf %89, %92 : vector<16x16xf32>
    %94 = math.exp %93 : vector<16x16xf32>
    %cst_28 = arith.constant dense<0.000000e+00> : vector<16xf32>
    %95 = vector.multi_reduction <add>, %94, %cst_28 [1] : vector<16x16xf32> to vector<16xf32>
    %96 = vector.shape_cast %95 : vector<16xf32> to vector<16x1xf32>
    %97 = tpu.reciprocal %96 {approx = true} : vector<16x1xf32> -> vector<16x1xf32>
    %98 = vector.broadcast %97 : vector<16x1xf32> to vector<16x16xf32>
    %99 = arith.mulf %94, %98 : vector<16x16xf32>
    %100 = vector.broadcast %25 : vector<1x32xf32> to vector<16x32xf32>
    %101 = arith.mulf %42, %100 : vector<16x32xf32>
    %cst_29 = arith.constant dense<0.000000e+00> : vector<16x32xf32>
    %102 = tpu.matmul %99, %101, %cst_29 {dimension_numbers = #tpu.dot_dimension_numbers<[1], [0], [0], [1], [0, 0, 1, 1], [], []>} : vector<16x16xf32>, vector<16x32xf32>, vector<16x32xf32> -> vector<16x32xf32>
    %103 = arith.addf %83, %102 : vector<16x32xf32>
    %104 = vector.broadcast %32 : vector<1x32xf32> to vector<16x32xf32>
    %105 = arith.mulf %40, %104 : vector<16x32xf32>
    %cst_30 = arith.constant dense<0.000000e+00> : vector<16x16xf32>
    %106 = tpu.matmul %105, %41, %cst_30 {dimension_numbers = #tpu.dot_dimension_numbers<[1], [1], [0], [0], [0, 0, 1, 0], [], []>} : vector<16x32xf32>, vector<16x32xf32>, vector<16x16xf32> -> vector<16x16xf32>
    %cst_31 = arith.constant 0.353553385 : f32
    %107 = vector.broadcast %cst_31 : f32 to vector<16x16xf32>
    %108 = arith.mulf %106, %107 : vector<16x16xf32>
    %109 = arith.addf %108, %3 : vector<16x16xf32>
    %cst_32 = arith.constant dense<0xFF800000> : vector<16xf32>
    %110 = vector.multi_reduction <maximumf>, %109, %cst_32 [1] : vector<16x16xf32> to vector<16xf32>
    %111 = vector.shape_cast %110 : vector<16xf32> to vector<16x1xf32>
    %112 = vector.broadcast %111 : vector<16x1xf32> to vector<16x16xf32>
    %113 = arith.subf %109, %112 : vector<16x16xf32>
    %114 = math.exp %113 : vector<16x16xf32>
    %cst_33 = arith.constant dense<0.000000e+00> : vector<16xf32>
    %115 = vector.multi_reduction <add>, %114, %cst_33 [1] : vector<16x16xf32> to vector<16xf32>
    %116 = vector.shape_cast %115 : vector<16xf32> to vector<16x1xf32>
    %117 = tpu.reciprocal %116 {approx = true} : vector<16x1xf32> -> vector<16x1xf32>
    %118 = vector.broadcast %117 : vector<16x1xf32> to vector<16x16xf32>
    %119 = arith.mulf %114, %118 : vector<16x16xf32>
    %120 = vector.broadcast %32 : vector<1x32xf32> to vector<16x32xf32>
    %121 = arith.mulf %42, %120 : vector<16x32xf32>
    %cst_34 = arith.constant dense<0.000000e+00> : vector<16x32xf32>
    %122 = tpu.matmul %119, %121, %cst_34 {dimension_numbers = #tpu.dot_dimension_numbers<[1], [0], [0], [1], [0, 0, 1, 1], [], []>} : vector<16x16xf32>, vector<16x32xf32>, vector<16x32xf32> -> vector<16x32xf32>
    %123 = arith.addf %103, %122 : vector<16x32xf32>
    %c0_35 = arith.constant 0 : index
    %c0_36 = arith.constant 0 : index
    %c0_37 = arith.constant 0 : index
    %124 = vector.load %arg6[%c0_35, %c0_36, %c0_37] : memref<2x32x32xf32, #tpu.memory_space<vmem>>, vector<1x32x32xf32>
    %125 = vector.shape_cast %124 : vector<1x32x32xf32> to vector<32x32xf32>
    %cst_38 = arith.constant dense<0.000000e+00> : vector<16x32xf32>
    %126 = tpu.matmul %123, %125, %cst_38 {dimension_numbers = #tpu.dot_dimension_numbers<[1], [0], [0], [1], [0, 0, 1, 1], [], []>} : vector<16x32xf32>, vector<32x32xf32>, vector<16x32xf32> -> vector<16x32xf32>
    %c0_39 = arith.constant 0 : index
    %c0_40 = arith.constant 0 : index
    %c0_41 = arith.constant 0 : index
    %127 = vector.load %arg7[%c0_39, %c0_40, %c0_41] : memref<2x1x32xf32, #tpu.memory_space<vmem>>, vector<1x1x32xf32>
    %128 = vector.shape_cast %127 : vector<1x1x32xf32> to vector<1x32xf32>
    %129 = vector.broadcast %128 : vector<1x32xf32> to vector<16x32xf32>
    %130 = arith.addf %126, %129 : vector<16x32xf32>
    %131 = arith.addf %2, %130 : vector<16x32xf32>
    %c0_42 = arith.constant 0 : index
    %c0_43 = arith.constant 0 : index
    %c0_44 = arith.constant 0 : index
    %132 = vector.load %arg8[%c0_42, %c0_43, %c0_44] : memref<2x1x32xf32, #tpu.memory_space<vmem>>, vector<1x1x32xf32>
    %133 = vector.shape_cast %132 : vector<1x1x32xf32> to vector<1x32xf32>
    %c0_45 = arith.constant 0 : index
    %c0_46 = arith.constant 0 : index
    %c0_47 = arith.constant 0 : index
    %134 = vector.load %arg9[%c0_45, %c0_46, %c0_47] : memref<2x1x32xf32, #tpu.memory_space<vmem>>, vector<1x1x32xf32>
    %135 = vector.shape_cast %134 : vector<1x1x32xf32> to vector<1x32xf32>
    %cst_48 = arith.constant dense<0.000000e+00> : vector<16xf32>
    %136 = vector.multi_reduction <add>, %131, %cst_48 [1] : vector<16x32xf32> to vector<16xf32>
    %137 = vector.shape_cast %136 : vector<16xf32> to vector<16x1xf32>
    %cst_49 = arith.constant 3.200000e+01 : f32
    %138 = vector.broadcast %cst_49 : f32 to vector<16x1xf32>
    %139 = arith.divf %137, %138 : vector<16x1xf32>
    %140 = vector.broadcast %139 : vector<16x1xf32> to vector<16x32xf32>
    %141 = arith.subf %131, %140 : vector<16x32xf32>
    %142 = arith.mulf %141, %141 : vector<16x32xf32>
    %cst_50 = arith.constant dense<0.000000e+00> : vector<16xf32>
    %143 = vector.multi_reduction <add>, %142, %cst_50 [1] : vector<16x32xf32> to vector<16xf32>
    %144 = vector.shape_cast %143 : vector<16xf32> to vector<16x1xf32>
    %cst_51 = arith.constant 3.200000e+01 : f32
    %145 = vector.broadcast %cst_51 : f32 to vector<16x1xf32>
    %146 = arith.divf %144, %145 : vector<16x1xf32>
    %147 = vector.broadcast %139 : vector<16x1xf32> to vector<16x32xf32>
    %148 = arith.subf %131, %147 : vector<16x32xf32>
    %cst_52 = arith.constant 9.99999974E-6 : f32
    %149 = vector.broadcast %cst_52 : f32 to vector<16x1xf32>
    %150 = arith.addf %146, %149 : vector<16x1xf32>
    %151 = math.rsqrt %150 : vector<16x1xf32>
    %152 = vector.broadcast %151 : vector<16x1xf32> to vector<16x32xf32>
    %153 = arith.mulf %148, %152 : vector<16x32xf32>
    %154 = vector.broadcast %133 : vector<1x32xf32> to vector<16x32xf32>
    %155 = arith.mulf %153, %154 : vector<16x32xf32>
    %156 = vector.broadcast %135 : vector<1x32xf32> to vector<16x32xf32>
    %157 = arith.addf %155, %156 : vector<16x32xf32>
    %c0_53 = arith.constant 0 : index
    %c0_54 = arith.constant 0 : index
    %c0_55 = arith.constant 0 : index
    %158 = vector.load %arg10[%c0_53, %c0_54, %c0_55] : memref<2x32x128xf32, #tpu.memory_space<vmem>>, vector<1x32x128xf32>
    %159 = vector.shape_cast %158 : vector<1x32x128xf32> to vector<32x128xf32>
    %cst_56 = arith.constant dense<0.000000e+00> : vector<16x128xf32>
    %160 = tpu.matmul %157, %159, %cst_56 {dimension_numbers = #tpu.dot_dimension_numbers<[1], [0], [0], [1], [0, 0, 1, 1], [], []>} : vector<16x32xf32>, vector<32x128xf32>, vector<16x128xf32> -> vector<16x128xf32>
    %c0_57 = arith.constant 0 : index
    %c0_58 = arith.constant 0 : index
    %c0_59 = arith.constant 0 : index
    %161 = vector.load %arg11[%c0_57, %c0_58, %c0_59] : memref<2x1x128xf32, #tpu.memory_space<vmem>>, vector<1x1x128xf32>
    %162 = vector.shape_cast %161 : vector<1x1x128xf32> to vector<1x128xf32>
    %163 = vector.broadcast %162 : vector<1x128xf32> to vector<16x128xf32>
    %164 = arith.addf %160, %163 : vector<16x128xf32>
    %cst_60 = arith.constant 0.000000e+00 : f32
    %165 = vector.broadcast %cst_60 : f32 to vector<16x128xf32>
    %166 = arith.maximumf %164, %165 : vector<16x128xf32>
    %c0_61 = arith.constant 0 : index
    %c0_62 = arith.constant 0 : index
    %c0_63 = arith.constant 0 : index
    %167 = vector.load %arg12[%c0_61, %c0_62, %c0_63] : memref<2x128x32xf32, #tpu.memory_space<vmem>>, vector<1x128x32xf32>
    %168 = vector.shape_cast %167 : vector<1x128x32xf32> to vector<128x32xf32>
    %cst_64 = arith.constant dense<0.000000e+00> : vector<16x32xf32>
    %169 = tpu.matmul %166, %168, %cst_64 {dimension_numbers = #tpu.dot_dimension_numbers<[1], [0], [0], [1], [0, 0, 1, 1], [], []>} : vector<16x128xf32>, vector<128x32xf32>, vector<16x32xf32> -> vector<16x32xf32>
    %c0_65 = arith.constant 0 : index
    %c0_66 = arith.constant 0 : index
    %c0_67 = arith.constant 0 : index
    %170 = vector.load %arg13[%c0_65, %c0_66, %c0_67] : memref<2x1x32xf32, #tpu.memory_space<vmem>>, vector<1x1x32xf32>
    %171 = vector.shape_cast %170 : vector<1x1x32xf32> to vector<1x32xf32>
    %172 = vector.broadcast %171 : vector<1x32xf32> to vector<16x32xf32>
    %173 = arith.addf %169, %172 : vector<16x32xf32>
    %174 = arith.addf %157, %173 : vector<16x32xf32>
    %c0_68 = arith.constant 0 : index
    %c0_69 = arith.constant 0 : index
    %c0_70 = arith.constant 0 : index
    %175 = vector.load %arg14[%c0_68, %c0_69, %c0_70] : memref<2x1x32xf32, #tpu.memory_space<vmem>>, vector<1x1x32xf32>
    %176 = vector.shape_cast %175 : vector<1x1x32xf32> to vector<1x32xf32>
    %c0_71 = arith.constant 0 : index
    %c0_72 = arith.constant 0 : index
    %c0_73 = arith.constant 0 : index
    %177 = vector.load %arg15[%c0_71, %c0_72, %c0_73] : memref<2x1x32xf32, #tpu.memory_space<vmem>>, vector<1x1x32xf32>
    %178 = vector.shape_cast %177 : vector<1x1x32xf32> to vector<1x32xf32>
    %cst_74 = arith.constant dense<0.000000e+00> : vector<16xf32>
    %179 = vector.multi_reduction <add>, %174, %cst_74 [1] : vector<16x32xf32> to vector<16xf32>
    %180 = vector.shape_cast %179 : vector<16xf32> to vector<16x1xf32>
    %cst_75 = arith.constant 3.200000e+01 : f32
    %181 = vector.broadcast %cst_75 : f32 to vector<16x1xf32>
    %182 = arith.divf %180, %181 : vector<16x1xf32>
    %183 = vector.broadcast %182 : vector<16x1xf32> to vector<16x32xf32>
    %184 = arith.subf %174, %183 : vector<16x32xf32>
    %185 = arith.mulf %184, %184 : vector<16x32xf32>
    %cst_76 = arith.constant dense<0.000000e+00> : vector<16xf32>
    %186 = vector.multi_reduction <add>, %185, %cst_76 [1] : vector<16x32xf32> to vector<16xf32>
    %187 = vector.shape_cast %186 : vector<16xf32> to vector<16x1xf32>
    %cst_77 = arith.constant 3.200000e+01 : f32
    %188 = vector.broadcast %cst_77 : f32 to vector<16x1xf32>
    %189 = arith.divf %187, %188 : vector<16x1xf32>
    %190 = vector.broadcast %182 : vector<16x1xf32> to vector<16x32xf32>
    %191 = arith.subf %174, %190 : vector<16x32xf32>
    %cst_78 = arith.constant 9.99999974E-6 : f32
    %192 = vector.broadcast %cst_78 : f32 to vector<16x1xf32>
    %193 = arith.addf %189, %192 : vector<16x1xf32>
    %194 = math.rsqrt %193 : vector<16x1xf32>
    %195 = vector.broadcast %194 : vector<16x1xf32> to vector<16x32xf32>
    %196 = arith.mulf %191, %195 : vector<16x32xf32>
    %197 = vector.broadcast %176 : vector<1x32xf32> to vector<16x32xf32>
    %198 = arith.mulf %196, %197 : vector<16x32xf32>
    %199 = vector.broadcast %178 : vector<1x32xf32> to vector<16x32xf32>
    %200 = arith.addf %198, %199 : vector<16x32xf32>
    %c1 = arith.constant 1 : index
    %c0_79 = arith.constant 0 : index
    %c0_80 = arith.constant 0 : index
    %201 = vector.load %arg4[%c1, %c0_79, %c0_80] : memref<2x32x96xf32, #tpu.memory_space<vmem>>, vector<1x32x96xf32>
    %202 = vector.shape_cast %201 : vector<1x32x96xf32> to vector<32x96xf32>
    %cst_81 = arith.constant dense<0.000000e+00> : vector<16x96xf32>
    %203 = tpu.matmul %200, %202, %cst_81 {dimension_numbers = #tpu.dot_dimension_numbers<[1], [0], [0], [1], [0, 0, 1, 1], [], []>} : vector<16x32xf32>, vector<32x96xf32>, vector<16x96xf32> -> vector<16x96xf32>
    %c1_82 = arith.constant 1 : index
    %c0_83 = arith.constant 0 : index
    %c0_84 = arith.constant 0 : index
    %204 = vector.load %arg5[%c1_82, %c0_83, %c0_84] : memref<2x1x96xf32, #tpu.memory_space<vmem>>, vector<1x1x96xf32>
    %205 = vector.shape_cast %204 : vector<1x1x96xf32> to vector<1x96xf32>
    %206 = vector.broadcast %205 : vector<1x96xf32> to vector<16x96xf32>
    %207 = arith.addf %203, %206 : vector<16x96xf32>
    %208 = vector.extract_strided_slice %207 {offsets = [0, 0], sizes = [16, 32], strides = [1, 1]} : vector<16x96xf32> to vector<16x32xf32>
    %209 = vector.extract_strided_slice %207 {offsets = [0, 32], sizes = [16, 32], strides = [1, 1]} : vector<16x96xf32> to vector<16x32xf32>
    %210 = vector.extract_strided_slice %207 {offsets = [0, 64], sizes = [16, 32], strides = [1, 1]} : vector<16x96xf32> to vector<16x32xf32>
    %cst_85 = arith.constant 0.000000e+00 : f32
    %211 = vector.broadcast %cst_85 : f32 to vector<16x32xf32>
    %212 = vector.broadcast %11 : vector<1x32xf32> to vector<16x32xf32>
    %213 = arith.mulf %208, %212 : vector<16x32xf32>
    %cst_86 = arith.constant dense<0.000000e+00> : vector<16x16xf32>
    %214 = tpu.matmul %213, %209, %cst_86 {dimension_numbers = #tpu.dot_dimension_numbers<[1], [1], [0], [0], [0, 0, 1, 0], [], []>} : vector<16x32xf32>, vector<16x32xf32>, vector<16x16xf32> -> vector<16x16xf32>
    %cst_87 = arith.constant 0.353553385 : f32
    %215 = vector.broadcast %cst_87 : f32 to vector<16x16xf32>
    %216 = arith.mulf %214, %215 : vector<16x16xf32>
    %217 = arith.addf %216, %3 : vector<16x16xf32>
    %cst_88 = arith.constant dense<0xFF800000> : vector<16xf32>
    %218 = vector.multi_reduction <maximumf>, %217, %cst_88 [1] : vector<16x16xf32> to vector<16xf32>
    %219 = vector.shape_cast %218 : vector<16xf32> to vector<16x1xf32>
    %220 = vector.broadcast %219 : vector<16x1xf32> to vector<16x16xf32>
    %221 = arith.subf %217, %220 : vector<16x16xf32>
    %222 = math.exp %221 : vector<16x16xf32>
    %cst_89 = arith.constant dense<0.000000e+00> : vector<16xf32>
    %223 = vector.multi_reduction <add>, %222, %cst_89 [1] : vector<16x16xf32> to vector<16xf32>
    %224 = vector.shape_cast %223 : vector<16xf32> to vector<16x1xf32>
    %225 = tpu.reciprocal %224 {approx = true} : vector<16x1xf32> -> vector<16x1xf32>
    %226 = vector.broadcast %225 : vector<16x1xf32> to vector<16x16xf32>
    %227 = arith.mulf %222, %226 : vector<16x16xf32>
    %228 = vector.broadcast %11 : vector<1x32xf32> to vector<16x32xf32>
    %229 = arith.mulf %210, %228 : vector<16x32xf32>
    %cst_90 = arith.constant dense<0.000000e+00> : vector<16x32xf32>
    %230 = tpu.matmul %227, %229, %cst_90 {dimension_numbers = #tpu.dot_dimension_numbers<[1], [0], [0], [1], [0, 0, 1, 1], [], []>} : vector<16x16xf32>, vector<16x32xf32>, vector<16x32xf32> -> vector<16x32xf32>
    %231 = arith.addf %211, %230 : vector<16x32xf32>
    %232 = vector.broadcast %18 : vector<1x32xf32> to vector<16x32xf32>
    %233 = arith.mulf %208, %232 : vector<16x32xf32>
    %cst_91 = arith.constant dense<0.000000e+00> : vector<16x16xf32>
    %234 = tpu.matmul %233, %209, %cst_91 {dimension_numbers = #tpu.dot_dimension_numbers<[1], [1], [0], [0], [0, 0, 1, 0], [], []>} : vector<16x32xf32>, vector<16x32xf32>, vector<16x16xf32> -> vector<16x16xf32>
    %cst_92 = arith.constant 0.353553385 : f32
    %235 = vector.broadcast %cst_92 : f32 to vector<16x16xf32>
    %236 = arith.mulf %234, %235 : vector<16x16xf32>
    %237 = arith.addf %236, %3 : vector<16x16xf32>
    %cst_93 = arith.constant dense<0xFF800000> : vector<16xf32>
    %238 = vector.multi_reduction <maximumf>, %237, %cst_93 [1] : vector<16x16xf32> to vector<16xf32>
    %239 = vector.shape_cast %238 : vector<16xf32> to vector<16x1xf32>
    %240 = vector.broadcast %239 : vector<16x1xf32> to vector<16x16xf32>
    %241 = arith.subf %237, %240 : vector<16x16xf32>
    %242 = math.exp %241 : vector<16x16xf32>
    %cst_94 = arith.constant dense<0.000000e+00> : vector<16xf32>
    %243 = vector.multi_reduction <add>, %242, %cst_94 [1] : vector<16x16xf32> to vector<16xf32>
    %244 = vector.shape_cast %243 : vector<16xf32> to vector<16x1xf32>
    %245 = tpu.reciprocal %244 {approx = true} : vector<16x1xf32> -> vector<16x1xf32>
    %246 = vector.broadcast %245 : vector<16x1xf32> to vector<16x16xf32>
    %247 = arith.mulf %242, %246 : vector<16x16xf32>
    %248 = vector.broadcast %18 : vector<1x32xf32> to vector<16x32xf32>
    %249 = arith.mulf %210, %248 : vector<16x32xf32>
    %cst_95 = arith.constant dense<0.000000e+00> : vector<16x32xf32>
    %250 = tpu.matmul %247, %249, %cst_95 {dimension_numbers = #tpu.dot_dimension_numbers<[1], [0], [0], [1], [0, 0, 1, 1], [], []>} : vector<16x16xf32>, vector<16x32xf32>, vector<16x32xf32> -> vector<16x32xf32>
    %251 = arith.addf %231, %250 : vector<16x32xf32>
    %252 = vector.broadcast %25 : vector<1x32xf32> to vector<16x32xf32>
    %253 = arith.mulf %208, %252 : vector<16x32xf32>
    %cst_96 = arith.constant dense<0.000000e+00> : vector<16x16xf32>
    %254 = tpu.matmul %253, %209, %cst_96 {dimension_numbers = #tpu.dot_dimension_numbers<[1], [1], [0], [0], [0, 0, 1, 0], [], []>} : vector<16x32xf32>, vector<16x32xf32>, vector<16x16xf32> -> vector<16x16xf32>
    %cst_97 = arith.constant 0.353553385 : f32
    %255 = vector.broadcast %cst_97 : f32 to vector<16x16xf32>
    %256 = arith.mulf %254, %255 : vector<16x16xf32>
    %257 = arith.addf %256, %3 : vector<16x16xf32>
    %cst_98 = arith.constant dense<0xFF800000> : vector<16xf32>
    %258 = vector.multi_reduction <maximumf>, %257, %cst_98 [1] : vector<16x16xf32> to vector<16xf32>
    %259 = vector.shape_cast %258 : vector<16xf32> to vector<16x1xf32>
    %260 = vector.broadcast %259 : vector<16x1xf32> to vector<16x16xf32>
    %261 = arith.subf %257, %260 : vector<16x16xf32>
    %262 = math.exp %261 : vector<16x16xf32>
    %cst_99 = arith.constant dense<0.000000e+00> : vector<16xf32>
    %263 = vector.multi_reduction <add>, %262, %cst_99 [1] : vector<16x16xf32> to vector<16xf32>
    %264 = vector.shape_cast %263 : vector<16xf32> to vector<16x1xf32>
    %265 = tpu.reciprocal %264 {approx = true} : vector<16x1xf32> -> vector<16x1xf32>
    %266 = vector.broadcast %265 : vector<16x1xf32> to vector<16x16xf32>
    %267 = arith.mulf %262, %266 : vector<16x16xf32>
    %268 = vector.broadcast %25 : vector<1x32xf32> to vector<16x32xf32>
    %269 = arith.mulf %210, %268 : vector<16x32xf32>
    %cst_100 = arith.constant dense<0.000000e+00> : vector<16x32xf32>
    %270 = tpu.matmul %267, %269, %cst_100 {dimension_numbers = #tpu.dot_dimension_numbers<[1], [0], [0], [1], [0, 0, 1, 1], [], []>} : vector<16x16xf32>, vector<16x32xf32>, vector<16x32xf32> -> vector<16x32xf32>
    %271 = arith.addf %251, %270 : vector<16x32xf32>
    %272 = vector.broadcast %32 : vector<1x32xf32> to vector<16x32xf32>
    %273 = arith.mulf %208, %272 : vector<16x32xf32>
    %cst_101 = arith.constant dense<0.000000e+00> : vector<16x16xf32>
    %274 = tpu.matmul %273, %209, %cst_101 {dimension_numbers = #tpu.dot_dimension_numbers<[1], [1], [0], [0], [0, 0, 1, 0], [], []>} : vector<16x32xf32>, vector<16x32xf32>, vector<16x16xf32> -> vector<16x16xf32>
    %cst_102 = arith.constant 0.353553385 : f32
    %275 = vector.broadcast %cst_102 : f32 to vector<16x16xf32>
    %276 = arith.mulf %274, %275 : vector<16x16xf32>
    %277 = arith.addf %276, %3 : vector<16x16xf32>
    %cst_103 = arith.constant dense<0xFF800000> : vector<16xf32>
    %278 = vector.multi_reduction <maximumf>, %277, %cst_103 [1] : vector<16x16xf32> to vector<16xf32>
    %279 = vector.shape_cast %278 : vector<16xf32> to vector<16x1xf32>
    %280 = vector.broadcast %279 : vector<16x1xf32> to vector<16x16xf32>
    %281 = arith.subf %277, %280 : vector<16x16xf32>
    %282 = math.exp %281 : vector<16x16xf32>
    %cst_104 = arith.constant dense<0.000000e+00> : vector<16xf32>
    %283 = vector.multi_reduction <add>, %282, %cst_104 [1] : vector<16x16xf32> to vector<16xf32>
    %284 = vector.shape_cast %283 : vector<16xf32> to vector<16x1xf32>
    %285 = tpu.reciprocal %284 {approx = true} : vector<16x1xf32> -> vector<16x1xf32>
    %286 = vector.broadcast %285 : vector<16x1xf32> to vector<16x16xf32>
    %287 = arith.mulf %282, %286 : vector<16x16xf32>
    %288 = vector.broadcast %32 : vector<1x32xf32> to vector<16x32xf32>
    %289 = arith.mulf %210, %288 : vector<16x32xf32>
    %cst_105 = arith.constant dense<0.000000e+00> : vector<16x32xf32>
    %290 = tpu.matmul %287, %289, %cst_105 {dimension_numbers = #tpu.dot_dimension_numbers<[1], [0], [0], [1], [0, 0, 1, 1], [], []>} : vector<16x16xf32>, vector<16x32xf32>, vector<16x32xf32> -> vector<16x32xf32>
    %291 = arith.addf %271, %290 : vector<16x32xf32>
    %c1_106 = arith.constant 1 : index
    %c0_107 = arith.constant 0 : index
    %c0_108 = arith.constant 0 : index
    %292 = vector.load %arg6[%c1_106, %c0_107, %c0_108] : memref<2x32x32xf32, #tpu.memory_space<vmem>>, vector<1x32x32xf32>
    %293 = vector.shape_cast %292 : vector<1x32x32xf32> to vector<32x32xf32>
    %cst_109 = arith.constant dense<0.000000e+00> : vector<16x32xf32>
    %294 = tpu.matmul %291, %293, %cst_109 {dimension_numbers = #tpu.dot_dimension_numbers<[1], [0], [0], [1], [0, 0, 1, 1], [], []>} : vector<16x32xf32>, vector<32x32xf32>, vector<16x32xf32> -> vector<16x32xf32>
    %c1_110 = arith.constant 1 : index
    %c0_111 = arith.constant 0 : index
    %c0_112 = arith.constant 0 : index
    %295 = vector.load %arg7[%c1_110, %c0_111, %c0_112] : memref<2x1x32xf32, #tpu.memory_space<vmem>>, vector<1x1x32xf32>
    %296 = vector.shape_cast %295 : vector<1x1x32xf32> to vector<1x32xf32>
    %297 = vector.broadcast %296 : vector<1x32xf32> to vector<16x32xf32>
    %298 = arith.addf %294, %297 : vector<16x32xf32>
    %299 = arith.addf %200, %298 : vector<16x32xf32>
    %c1_113 = arith.constant 1 : index
    %c0_114 = arith.constant 0 : index
    %c0_115 = arith.constant 0 : index
    %300 = vector.load %arg8[%c1_113, %c0_114, %c0_115] : memref<2x1x32xf32, #tpu.memory_space<vmem>>, vector<1x1x32xf32>
    %301 = vector.shape_cast %300 : vector<1x1x32xf32> to vector<1x32xf32>
    %c1_116 = arith.constant 1 : index
    %c0_117 = arith.constant 0 : index
    %c0_118 = arith.constant 0 : index
    %302 = vector.load %arg9[%c1_116, %c0_117, %c0_118] : memref<2x1x32xf32, #tpu.memory_space<vmem>>, vector<1x1x32xf32>
    %303 = vector.shape_cast %302 : vector<1x1x32xf32> to vector<1x32xf32>
    %cst_119 = arith.constant dense<0.000000e+00> : vector<16xf32>
    %304 = vector.multi_reduction <add>, %299, %cst_119 [1] : vector<16x32xf32> to vector<16xf32>
    %305 = vector.shape_cast %304 : vector<16xf32> to vector<16x1xf32>
    %cst_120 = arith.constant 3.200000e+01 : f32
    %306 = vector.broadcast %cst_120 : f32 to vector<16x1xf32>
    %307 = arith.divf %305, %306 : vector<16x1xf32>
    %308 = vector.broadcast %307 : vector<16x1xf32> to vector<16x32xf32>
    %309 = arith.subf %299, %308 : vector<16x32xf32>
    %310 = arith.mulf %309, %309 : vector<16x32xf32>
    %cst_121 = arith.constant dense<0.000000e+00> : vector<16xf32>
    %311 = vector.multi_reduction <add>, %310, %cst_121 [1] : vector<16x32xf32> to vector<16xf32>
    %312 = vector.shape_cast %311 : vector<16xf32> to vector<16x1xf32>
    %cst_122 = arith.constant 3.200000e+01 : f32
    %313 = vector.broadcast %cst_122 : f32 to vector<16x1xf32>
    %314 = arith.divf %312, %313 : vector<16x1xf32>
    %315 = vector.broadcast %307 : vector<16x1xf32> to vector<16x32xf32>
    %316 = arith.subf %299, %315 : vector<16x32xf32>
    %cst_123 = arith.constant 9.99999974E-6 : f32
    %317 = vector.broadcast %cst_123 : f32 to vector<16x1xf32>
    %318 = arith.addf %314, %317 : vector<16x1xf32>
    %319 = math.rsqrt %318 : vector<16x1xf32>
    %320 = vector.broadcast %319 : vector<16x1xf32> to vector<16x32xf32>
    %321 = arith.mulf %316, %320 : vector<16x32xf32>
    %322 = vector.broadcast %301 : vector<1x32xf32> to vector<16x32xf32>
    %323 = arith.mulf %321, %322 : vector<16x32xf32>
    %324 = vector.broadcast %303 : vector<1x32xf32> to vector<16x32xf32>
    %325 = arith.addf %323, %324 : vector<16x32xf32>
    %c1_124 = arith.constant 1 : index
    %c0_125 = arith.constant 0 : index
    %c0_126 = arith.constant 0 : index
    %326 = vector.load %arg10[%c1_124, %c0_125, %c0_126] : memref<2x32x128xf32, #tpu.memory_space<vmem>>, vector<1x32x128xf32>
    %327 = vector.shape_cast %326 : vector<1x32x128xf32> to vector<32x128xf32>
    %cst_127 = arith.constant dense<0.000000e+00> : vector<16x128xf32>
    %328 = tpu.matmul %325, %327, %cst_127 {dimension_numbers = #tpu.dot_dimension_numbers<[1], [0], [0], [1], [0, 0, 1, 1], [], []>} : vector<16x32xf32>, vector<32x128xf32>, vector<16x128xf32> -> vector<16x128xf32>
    %c1_128 = arith.constant 1 : index
    %c0_129 = arith.constant 0 : index
    %c0_130 = arith.constant 0 : index
    %329 = vector.load %arg11[%c1_128, %c0_129, %c0_130] : memref<2x1x128xf32, #tpu.memory_space<vmem>>, vector<1x1x128xf32>
    %330 = vector.shape_cast %329 : vector<1x1x128xf32> to vector<1x128xf32>
    %331 = vector.broadcast %330 : vector<1x128xf32> to vector<16x128xf32>
    %332 = arith.addf %328, %331 : vector<16x128xf32>
    %cst_131 = arith.constant 0.000000e+00 : f32
    %333 = vector.broadcast %cst_131 : f32 to vector<16x128xf32>
    %334 = arith.maximumf %332, %333 : vector<16x128xf32>
    %c1_132 = arith.constant 1 : index
    %c0_133 = arith.constant 0 : index
    %c0_134 = arith.constant 0 : index
    %335 = vector.load %arg12[%c1_132, %c0_133, %c0_134] : memref<2x128x32xf32, #tpu.memory_space<vmem>>, vector<1x128x32xf32>
    %336 = vector.shape_cast %335 : vector<1x128x32xf32> to vector<128x32xf32>
    %cst_135 = arith.constant dense<0.000000e+00> : vector<16x32xf32>
    %337 = tpu.matmul %334, %336, %cst_135 {dimension_numbers = #tpu.dot_dimension_numbers<[1], [0], [0], [1], [0, 0, 1, 1], [], []>} : vector<16x128xf32>, vector<128x32xf32>, vector<16x32xf32> -> vector<16x32xf32>
    %c1_136 = arith.constant 1 : index
    %c0_137 = arith.constant 0 : index
    %c0_138 = arith.constant 0 : index
    %338 = vector.load %arg13[%c1_136, %c0_137, %c0_138] : memref<2x1x32xf32, #tpu.memory_space<vmem>>, vector<1x1x32xf32>
    %339 = vector.shape_cast %338 : vector<1x1x32xf32> to vector<1x32xf32>
    %340 = vector.broadcast %339 : vector<1x32xf32> to vector<16x32xf32>
    %341 = arith.addf %337, %340 : vector<16x32xf32>
    %342 = arith.addf %325, %341 : vector<16x32xf32>
    %c1_139 = arith.constant 1 : index
    %c0_140 = arith.constant 0 : index
    %c0_141 = arith.constant 0 : index
    %343 = vector.load %arg14[%c1_139, %c0_140, %c0_141] : memref<2x1x32xf32, #tpu.memory_space<vmem>>, vector<1x1x32xf32>
    %344 = vector.shape_cast %343 : vector<1x1x32xf32> to vector<1x32xf32>
    %c1_142 = arith.constant 1 : index
    %c0_143 = arith.constant 0 : index
    %c0_144 = arith.constant 0 : index
    %345 = vector.load %arg15[%c1_142, %c0_143, %c0_144] : memref<2x1x32xf32, #tpu.memory_space<vmem>>, vector<1x1x32xf32>
    %346 = vector.shape_cast %345 : vector<1x1x32xf32> to vector<1x32xf32>
    %cst_145 = arith.constant dense<0.000000e+00> : vector<16xf32>
    %347 = vector.multi_reduction <add>, %342, %cst_145 [1] : vector<16x32xf32> to vector<16xf32>
    %348 = vector.shape_cast %347 : vector<16xf32> to vector<16x1xf32>
    %cst_146 = arith.constant 3.200000e+01 : f32
    %349 = vector.broadcast %cst_146 : f32 to vector<16x1xf32>
    %350 = arith.divf %348, %349 : vector<16x1xf32>
    %351 = vector.broadcast %350 : vector<16x1xf32> to vector<16x32xf32>
    %352 = arith.subf %342, %351 : vector<16x32xf32>
    %353 = arith.mulf %352, %352 : vector<16x32xf32>
    %cst_147 = arith.constant dense<0.000000e+00> : vector<16xf32>
    %354 = vector.multi_reduction <add>, %353, %cst_147 [1] : vector<16x32xf32> to vector<16xf32>
    %355 = vector.shape_cast %354 : vector<16xf32> to vector<16x1xf32>
    %cst_148 = arith.constant 3.200000e+01 : f32
    %356 = vector.broadcast %cst_148 : f32 to vector<16x1xf32>
    %357 = arith.divf %355, %356 : vector<16x1xf32>
    %358 = vector.broadcast %350 : vector<16x1xf32> to vector<16x32xf32>
    %359 = arith.subf %342, %358 : vector<16x32xf32>
    %cst_149 = arith.constant 9.99999974E-6 : f32
    %360 = vector.broadcast %cst_149 : f32 to vector<16x1xf32>
    %361 = arith.addf %357, %360 : vector<16x1xf32>
    %362 = math.rsqrt %361 : vector<16x1xf32>
    %363 = vector.broadcast %362 : vector<16x1xf32> to vector<16x32xf32>
    %364 = arith.mulf %359, %363 : vector<16x32xf32>
    %365 = vector.broadcast %344 : vector<1x32xf32> to vector<16x32xf32>
    %366 = arith.mulf %364, %365 : vector<16x32xf32>
    %367 = vector.broadcast %346 : vector<1x32xf32> to vector<16x32xf32>
    %368 = arith.addf %366, %367 : vector<16x32xf32>
    %c0_150 = arith.constant 0 : index
    %c0_151 = arith.constant 0 : index
    %369 = vector.load %arg16[%c0_150, %c0_151] : memref<32x32xf32, #tpu.memory_space<vmem>>, vector<32x32xf32>
    %cst_152 = arith.constant dense<0.000000e+00> : vector<16x32xf32>
    %370 = tpu.matmul %368, %369, %cst_152 {dimension_numbers = #tpu.dot_dimension_numbers<[1], [0], [0], [1], [0, 0, 1, 1], [], []>} : vector<16x32xf32>, vector<32x32xf32>, vector<16x32xf32> -> vector<16x32xf32>
    %c0_153 = arith.constant 0 : index
    %c0_154 = arith.constant 0 : index
    %371 = vector.load %arg17[%c0_153, %c0_154] : memref<1x32xf32, #tpu.memory_space<vmem>>, vector<1x32xf32>
    %372 = vector.broadcast %371 : vector<1x32xf32> to vector<16x32xf32>
    %373 = arith.addf %370, %372 : vector<16x32xf32>
    %cst_155 = arith.constant 5.000000e-01 : f32
    %374 = vector.broadcast %cst_155 : f32 to vector<16x32xf32>
    %375 = arith.mulf %374, %373 : vector<16x32xf32>
    %cst_156 = arith.constant 4.471500e-02 : f32
    %376 = vector.broadcast %cst_156 : f32 to vector<16x32xf32>
    %377 = arith.mulf %376, %373 : vector<16x32xf32>
    %378 = arith.mulf %377, %373 : vector<16x32xf32>
    %379 = arith.mulf %378, %373 : vector<16x32xf32>
    %380 = arith.addf %373, %379 : vector<16x32xf32>
    %cst_157 = arith.constant 0.797884583 : f32
    %381 = vector.broadcast %cst_157 : f32 to vector<16x32xf32>
    %382 = arith.mulf %381, %380 : vector<16x32xf32>
    %383 = math.tanh %382 : vector<16x32xf32>
    %cst_158 = arith.constant 1.000000e+00 : f32
    %384 = vector.broadcast %cst_158 : f32 to vector<16x32xf32>
    %385 = arith.addf %384, %383 : vector<16x32xf32>
    %386 = arith.mulf %375, %385 : vector<16x32xf32>
    %c0_159 = arith.constant 0 : index
    %c0_160 = arith.constant 0 : index
    %387 = vector.load %arg18[%c0_159, %c0_160] : memref<32x16xf32, #tpu.memory_space<vmem>>, vector<32x16xf32>
    %cst_161 = arith.constant dense<0.000000e+00> : vector<16x16xf32>
    %388 = tpu.matmul %386, %387, %cst_161 {dimension_numbers = #tpu.dot_dimension_numbers<[1], [0], [0], [1], [0, 0, 1, 1], [], []>} : vector<16x32xf32>, vector<32x16xf32>, vector<16x16xf32> -> vector<16x16xf32>
    %c0_162 = arith.constant 0 : index
    %c0_163 = arith.constant 0 : index
    %389 = vector.load %arg19[%c0_162, %c0_163] : memref<1x16xf32, #tpu.memory_space<vmem>>, vector<1x16xf32>
    %390 = vector.broadcast %389 : vector<1x16xf32> to vector<16x16xf32>
    %391 = arith.addf %388, %390 : vector<16x16xf32>
    %cst_164 = arith.constant 5.000000e-01 : f32
    %392 = vector.broadcast %cst_164 : f32 to vector<16x16xf32>
    %393 = arith.mulf %392, %391 : vector<16x16xf32>
    %394 = math.exp %393 : vector<16x16xf32>
    %c0_165 = arith.constant 0 : index
    %c0_166 = arith.constant 0 : index
    %395 = vector.load %arg20[%c0_165, %c0_166] : memref<16x16xf32, #tpu.memory_space<vmem>>, vector<16x16xf32>
    %396 = arith.mulf %395, %394 : vector<16x16xf32>
    %397 = arith.addf %396, %391 : vector<16x16xf32>
    %398 = tpu.concatenate %397, %391 in 1 : vector<16x16xf32>, vector<16x16xf32> -> vector<16x32xf32>
    %c0_167 = arith.constant 0 : index
    %c0_168 = arith.constant 0 : index
    %399 = vector.load %arg21[%c0_167, %c0_168] : memref<16x32xf32, #tpu.memory_space<vmem>>, vector<16x32xf32>
    tpu.vector_store %arg21[%c0_167, %c0_168], %398 {strides = array<i32>} : memref<16x32xf32, #tpu.memory_space<vmem>>, vector<16x32xf32>,
    return
  }
  func.func @transform_0(%arg0: i32) -> (i32, i32) {
    %c0_i32 = arith.constant 0 : i32
    %c0_i32_0 = arith.constant 0 : i32
    %c0_i32_1 = arith.constant 0 : i32
    return %c0_i32, %c0_i32_0 : i32, i32
  }
  func.func @transform_1(%arg0: i32) -> (i32, i32) {
    %c0_i32 = arith.constant 0 : i32
    %c0_i32_0 = arith.constant 0 : i32
    %c0_i32_1 = arith.constant 0 : i32
    return %c0_i32, %c0_i32_0 : i32, i32
  }
  func.func @transform_2(%arg0: i32) -> (i32, i32) {
    %c0_i32 = arith.constant 0 : i32
    %c0_i32_0 = arith.constant 0 : i32
    %c0_i32_1 = arith.constant 0 : i32
    return %c0_i32, %c0_i32_0 : i32, i32
  }
  func.func @transform_3(%arg0: i32) -> (i32, i32, i32) {
    %c0_i32 = arith.constant 0 : i32
    %c0_i32_0 = arith.constant 0 : i32
    %c0_i32_1 = arith.constant 0 : i32
    %c0_i32_2 = arith.constant 0 : i32
    return %c0_i32, %c0_i32_0, %c0_i32_1 : i32, i32, i32
  }
  func.func @transform_4(%arg0: i32) -> (i32, i32, i32) {
    %c0_i32 = arith.constant 0 : i32
    %c0_i32_0 = arith.constant 0 : i32
    %c0_i32_1 = arith.constant 0 : i32
    %c0_i32_2 = arith.constant 0 : i32
    return %c0_i32, %c0_i32_0, %c0_i32_1 : i32, i32, i32
  }
  func.func @transform_5(%arg0: i32) -> (i32, i32, i32) {
    %c0_i32 = arith.constant 0 : i32
    %c0_i32_0 = arith.constant 0 : i32
    %c0_i32_1 = arith.constant 0 : i32
    %c0_i32_2 = arith.constant 0 : i32
    return %c0_i32, %c0_i32_0, %c0_i32_1 : i32, i32, i32
  }
  func.func @transform_6(%arg0: i32) -> (i32, i32, i32) {
    %c0_i32 = arith.constant 0 : i32
    %c0_i32_0 = arith.constant 0 : i32
    %c0_i32_1 = arith.constant 0 : i32
    %c0_i32_2 = arith.constant 0 : i32
    return %c0_i32, %c0_i32_0, %c0_i32_1 : i32, i32, i32
  }
  func.func @transform_7(%arg0: i32) -> (i32, i32, i32) {
    %c0_i32 = arith.constant 0 : i32
    %c0_i32_0 = arith.constant 0 : i32
    %c0_i32_1 = arith.constant 0 : i32
    %c0_i32_2 = arith.constant 0 : i32
    return %c0_i32, %c0_i32_0, %c0_i32_1 : i32, i32, i32
  }
  func.func @transform_8(%arg0: i32) -> (i32, i32, i32) {
    %c0_i32 = arith.constant 0 : i32
    %c0_i32_0 = arith.constant 0 : i32
    %c0_i32_1 = arith.constant 0 : i32
    %c0_i32_2 = arith.constant 0 : i32
    return %c0_i32, %c0_i32_0, %c0_i32_1 : i32, i32, i32
  }
  func.func @transform_9(%arg0: i32) -> (i32, i32, i32) {
    %c0_i32 = arith.constant 0 : i32
    %c0_i32_0 = arith.constant 0 : i32
    %c0_i32_1 = arith.constant 0 : i32
    %c0_i32_2 = arith.constant 0 : i32
    return %c0_i32, %c0_i32_0, %c0_i32_1 : i32, i32, i32
  }
  func.func @transform_10(%arg0: i32) -> (i32, i32, i32) {
    %c0_i32 = arith.constant 0 : i32
    %c0_i32_0 = arith.constant 0 : i32
    %c0_i32_1 = arith.constant 0 : i32
    %c0_i32_2 = arith.constant 0 : i32
    return %c0_i32, %c0_i32_0, %c0_i32_1 : i32, i32, i32
  }
  func.func @transform_11(%arg0: i32) -> (i32, i32, i32) {
    %c0_i32 = arith.constant 0 : i32
    %c0_i32_0 = arith.constant 0 : i32
    %c0_i32_1 = arith.constant 0 : i32
    %c0_i32_2 = arith.constant 0 : i32
    return %c0_i32, %c0_i32_0, %c0_i32_1 : i32, i32, i32
  }
  func.func @transform_12(%arg0: i32) -> (i32, i32, i32) {
    %c0_i32 = arith.constant 0 : i32
    %c0_i32_0 = arith.constant 0 : i32
    %c0_i32_1 = arith.constant 0 : i32
    %c0_i32_2 = arith.constant 0 : i32
    return %c0_i32, %c0_i32_0, %c0_i32_1 : i32, i32, i32
  }
  func.func @transform_13(%arg0: i32) -> (i32, i32, i32) {
    %c0_i32 = arith.constant 0 : i32
    %c0_i32_0 = arith.constant 0 : i32
    %c0_i32_1 = arith.constant 0 : i32
    %c0_i32_2 = arith.constant 0 : i32
    return %c0_i32, %c0_i32_0, %c0_i32_1 : i32, i32, i32
  }
  func.func @transform_14(%arg0: i32) -> (i32, i32, i32) {
    %c0_i32 = arith.constant 0 : i32
    %c0_i32_0 = arith.constant 0 : i32
    %c0_i32_1 = arith.constant 0 : i32
    %c0_i32_2 = arith.constant 0 : i32
    return %c0_i32, %c0_i32_0, %c0_i32_1 : i32, i32, i32
  }
  func.func @transform_15(%arg0: i32) -> (i32, i32) {
    %c0_i32 = arith.constant 0 : i32
    %c0_i32_0 = arith.constant 0 : i32
    %c0_i32_1 = arith.constant 0 : i32
    return %c0_i32, %c0_i32_0 : i32, i32
  }
  func.func @transform_16(%arg0: i32) -> (i32, i32) {
    %c0_i32 = arith.constant 0 : i32
    %c0_i32_0 = arith.constant 0 : i32
    %c0_i32_1 = arith.constant 0 : i32
    return %c0_i32, %c0_i32_0 : i32, i32
  }
  func.func @transform_17(%arg0: i32) -> (i32, i32) {
    %c0_i32 = arith.constant 0 : i32
    %c0_i32_0 = arith.constant 0 : i32
    %c0_i32_1 = arith.constant 0 : i32
    return %c0_i32, %c0_i32_0 : i32, i32
  }
  func.func @transform_18(%arg0: i32) -> (i32, i32) {
    %c0_i32 = arith.constant 0 : i32
    %c0_i32_0 = arith.constant 0 : i32
    %c0_i32_1 = arith.constant 0 : i32
    return %c0_i32, %c0_i32_0 : i32, i32
  }
  func.func @transform_19(%arg0: i32) -> (i32, i32) {
    %c0_i32 = arith.constant 0 : i32
    %c0_i32_0 = arith.constant 0 : i32
    %c0_i32_1 = arith.constant 0 : i32
    return %c0_i32, %c0_i32_0 : i32, i32
  }
  func.func @transform_20(%arg0: i32) -> (i32, i32) {
    %c0_i32 = arith.constant 0 : i32
    %c0_i32_0 = arith.constant 0 : i32
    %c0_i32_1 = arith.constant 0 : i32
    return %c0_i32, %c0_i32_0 : i32, i32
  }
}

</mosaic_0001>

<bundles_post_ra>
// kernel: tpu_custom_call.1
= control target key start
LH: loop header
LB: loop body
LE: loop exit
PB: predicated region body
PF: predicated region fallthrough
CT: control target
= control target key end

     0   :  { %s4606_s0 = inlined_call_operand.vmem [shape: f32[16,32], index: 0, kind: input, shape index: {}]   ;;  %s4607_s1 = inlined_call_operand.vmem [shape: f32[16,32], index: 1, kind: input, shape index: {}]   ;;  %s4608_s2 = inlined_call_operand.vmem [shape: f32[16,16], index: 2, kind: input, shape index: {}]   ;;  %s4609_s3 = inlined_call_operand.vmem [shape: f32[2,32,96], index: 3, kind: input, shape index: {}]   ;;  %s4610_s4 = inlined_call_operand.vmem [shape: f32[2,1,96], index: 4, kind: input, shape index: {}]   ;;  %s4611_s5 = inlined_call_operand.vmem [shape: f32[2,32,32], index: 5, kind: input, shape index: {}]   ;;  %s4612_s6 = inlined_call_operand.vmem [shape: f32[2,1,32], index: 6, kind: input, shape index: {}]   ;;  %s4613_s7 = inlined_call_operand.vmem [shape: f32[2,1,32], index: 7, kind: input, shape index: {}]   ;;  %s4614_s8 = inlined_call_operand.vmem [shape: f32[2,1,32], index: 8, kind: input, shape index: {}]   ;;  %s4615_s9 = inlined_call_operand.vmem [shape: f32[2,32,128], index: 9, kind: input, shape index: {}]   ;;  %s4616_s10 = inlined_call_operand.vmem [shape: f32[2,1,128], index: 10, kind: input, shape index: {}]   ;;  %s4617_s11 = inlined_call_operand.vmem [shape: f32[2,128,32], index: 11, kind: input, shape index: {}]   ;;  %s4618_s12 = inlined_call_operand.vmem [shape: f32[2,1,32], index: 12, kind: input, shape index: {}]   ;;  %s4619_s13 = inlined_call_operand.vmem [shape: f32[2,1,32], index: 13, kind: input, shape index: {}]   ;;  %s4620_s14 = inlined_call_operand.vmem [shape: f32[2,1,32], index: 14, kind: input, shape index: {}]   ;;  %s4621_s15 = inlined_call_operand.vmem [shape: f32[32,32], index: 15, kind: input, shape index: {}]   ;;  %s4622_s16 = inlined_call_operand.vmem [shape: f32[1,32], index: 16, kind: input, shape index: {}]   ;;  %s4623_s17 = inlined_call_operand.vmem [shape: f32[32,16], index: 17, kind: input, shape index: {}]   ;;  %s4624_s18 = inlined_call_operand.vmem [shape: f32[1,16], index: 18, kind: input, shape index: {}]   ;;  %s4625_s19 = inlined_call_operand.vmem [shape: f32[16,16], index: 19, kind: input, shape index: {}]   ;;  %s4626_s20 = inlined_call_operand.hbm [shape: f32[16,32], index: 20, kind: output, shape index: {}]  }
   0x1   :  { %4632 = sst [smem:[#allocation5_spill]] %s4606_s0 }
   0x2   :  { %4633 = sst [smem:[#allocation6_spill]] %s4607_s1 }
   0x3   :  { %4634 = sst [smem:[#allocation7_spill]] %s4608_s2 }
   0x4   :  { %4635 = sst [smem:[#allocation8_spill]] %s4609_s3 }
   0x5   :  { %4636 = sst [smem:[#allocation9_spill]] %s4610_s4 }
   0x6   :  { %s4637_s23 = sld [smem:[#allocation8_spill]]  ;;  %s4638_s29 = sld [smem:[#allocation5_spill]]  ;;  %vm107_vm0 = vcmask 261120  }
   0x7   :  { %s4639_s21 = sld [smem:[#allocation6_spill]] }
   0xc   :  { %v96_v0 = vld [vmem:[%s4637_s23] sm:$0xff]  ;;  %v97_v1 = vld [vmem:[%s4637_s23 + $0x8] sm:$0xff]  ;;  %v98_v2 = vld [vmem:[%s4637_s23 + $0x10] sm:$0xff] }
   0xd   :  { %v3473_v3 = vpack.c.bf16 %v97_v1, %v96_v0  ;;  %v99_v4 = vld [vmem:[%s4637_s23 + $0x18] sm:$0xff]  ;;  %v66_v5 = vld [vmem:[%s4638_s29] sm:$0xff] }
   0xe   :  { %v68_v6 = vld [vmem:[%s4639_s21] sm:$0xff]  ;;  %v3477_v7 = vpack.c.bf16 %v99_v4, %v98_v2 }
   0xf   :  { %v3992_v8 = vadd.f32 %v68_v6, %v66_v5 }
  0x10   :  { %25 = vsyncpa [#allocation3], 0  ;;  %3474 = vmatprep.subr.bf16.mxu1 %v3473_v3  ;;  %v67_v9 = vld [vmem:[%s4638_s29 + $0x8] sm:$0xff]  ;;  %v74_v12 = vlaneseq  ;;  %v3862_v14 = vmov 0.0   ;;  %s4640_s26 = sld [smem:[#allocation9_spill]]  ;;  %s3863_s27 = smov 96  }
  0x11   :  { %3476 = vmatpush3.bf16.msra.mxu1 %v3473_v3  ;;  %3211 = vmatprep.mubr.msk.f32.mxu1 %vm107_vm0, %v3992_v8  ;;  %v69_v10 = vld [vmem:[%s4639_s21 + $0x8] sm:$0xff]  ;;  %vm4032_vm11 = vmpackc.low %vm107_vm0, %vm107_vm0  ;;  %s4643_s29 = sld [smem:[#allocation7_spill]]  ;;  %vm286_vm12 = vcmask 130048   ;;  %s3864_s21 = smov 64  }
  0x12   :  { %3478 = vmatprep.subr.bf16.mxu1 %v3477_v7  ;;  %v4002_v11 = vadd.f32 %v69_v10, %v67_v9  ;;  %v75_v13 = vand.u32 127, %v74_v12 }
  0x14   :  { %vm86_vm1 = vcmp.ge.s32.totalorder %v75_v13, 16  ;;  %vm87_vm2 = vcmp.lt.s32.totalorder %v75_v13, 24  ;;  %vm91_vm4 = vcmp.ge.s32.totalorder %v75_v13, 24  ;;  %vm92_vm5 = vcmp.lt.s32.totalorder %v75_v13, 32 }
  0x15   :  { %3480 = vmatpush3.bf16.msra.mxu1 %v3477_v7  ;;  %vm88_vm3 = vmand %vm86_vm1, %vm87_vm2  ;;  %vm81_vm7 = vcmp.ge.s32.totalorder %v75_v13, 8  ;;  %vm82_vm8 = vcmp.lt.s32.totalorder %v75_v13, 16  ;;  %vm77_vm9 = vcmp.lt.s32.totalorder %v75_v13, 8 }
  0x16   :  { %v4006_v15 = vsel %vm88_vm3, 1.0, %v3862_v14  ;;  %vm93_vm6 = vmand %vm91_vm4, %vm92_vm5  ;;  %v2937_v17 = vld [vmem:[%s4640_s26] ss:$0 sm:$0xff]  ;;  %v4015_v21 = vsel %vm77_vm9, 1.0, %v3862_v14 }
  0x17   :  { %v4008_v16 = vsel %vm93_vm6, 1.0, %v3862_v14  ;;  %vm83_vm10 = vmand %vm81_vm7, %vm82_vm8  ;;  %v4071_v38 = vld [vmem:[%s4643_s29 + $0x8] sm:$0xff]  ;;  %v4076_v39 = vld [vmem:[%s4643_s29] sm:$0xff] }
  0x18   :  { %3212 = vmatmul.mubr.msk.f32.vlgmr.msra.gmra.mrb[0].mxu1 %vm107_vm0, %v4002_v11  ;;  %v4017_v22 = vsel %vm83_vm10, 1.0, %v3862_v14 }
  0xeb   :  { %v3213_v18 = vpop.f32.mrb[0].mxu1 }
  0xec   :  { %v4013_v19 = vadd.f32 %v3213_v18, %v2937_v17  ;;  %v180_v20 = vpop.f32.mrb[1].mxu1 }
  0xed   :  { %v4019_v23 = vadd.f32 %v2937_v17, %v180_v20 }
  0xee   :  { %v190_v32 = vmul.f32 %v4015_v21, %v4013_v19  ;;  %v316_v33 = vmul.f32 %v4017_v22, %v4013_v19  ;;  %v609_v35 = vmul.f32 %v4006_v15, %v4013_v19 }
  0xef   :  { %v3700_v24 = vpack.i.bf16 %v4013_v19, %v4019_v23  ;;  %v189_v25 = vmul.f32 %v4015_v21, %v4019_v23  ;;  %v315_v26 = vmul.f32 %v4017_v22, %v4019_v23  ;;  %v608_v34 = vmul.f32 %v4006_v15, %v4019_v23 }
  0xf1   :  { %3701 = vrot.lane.b32.xlu0 %v3700_v24, %s3863_s27  ;;  %3218 = vmatprep.mubr.msk.f32.mxu1 %vm107_vm0, %v189_v25 }
  0xf2   :  { %3225 = vmatprep.mubr.msk.f32.mxu0 %vm107_vm0, %v315_v26 }
 0x163   :  { %v3702_v27 = vpop.permute.xlu0 %3701 }
 0x164   :  { %v3704_v28 = vunpack.i.h.bf16 %v3702_v27  ;;  %v3703_v29 = vunpack.i.l.bf16 %v3702_v27 }
 0x166   :  { %v4036_v31 = vpack.c.bf16 %v3704_v28, %v3703_v29 }
 0x168   :  { %3483 = vmatprep.subr.msk.bf16.mxu1 %vm4032_vm11, %v4036_v31  ;;  %3489 = vmatprep.subr.msk.bf16.mxu0 %vm4032_vm11, %v4036_v31 }
 0x169   :  { %3486 = vmatpush3.bf16.xpose.msk.msra.mxu1 %vm4032_vm11, %v4036_v31  ;;  %3492 = vmatpush3.bf16.xpose.msk.msra.mxu0 %vm4032_vm11, %v4036_v31 }
 0x16a   :  { %3503 = vmatprep.subr.msk.bf16.mxu0 %vm4032_vm11, %v4036_v31 }
 0x170   :  { %3219 = vmatmul.mubr.msk.f32.vlgmr.msra.gmra.mrb[2].mxu1 %vm107_vm0, %v190_v32  ;;  %3226 = vmatmul.mubr.msk.f32.vlgmr.msra.gmra.mrb[0].mxu0 %vm107_vm0, %v316_v33 }
 0x171   :  { %3506 = vmatpush3.bf16.xpose.msk.msra.mxu0 %vm4032_vm11, %v4036_v31  ;;  %3246 = vmatprep.mubr.msk.f32.mxu0 %vm107_vm0, %v608_v34 }
 0x178   :  { %3247 = vmatmul.mubr.msk.f32.vlgmr.msra.gmra.mrb[2].mxu0 %vm107_vm0, %v609_v35 }
 0x243   :  { %v3220_v36 = vpop.f32.mrb[2].mxu1  ;;  %v3227_v37 = vpop.f32.mrb[0].mxu0 }
 0x244   :  { %v283_v40 = vmul.f32 0.35355338, %v3220_v36  ;;  %v399_v41 = vmul.f32 0.35355338, %v3227_v37  ;;  %v273_v42 = vpop.f32.mrb[3].mxu1  ;;  %v389_v43 = vpop.f32.mrb[1].mxu0 }
 0x245   :  { %v398_v44 = vmul.f32 0.35355338, %v389_v43  ;;  %v282_v53 = vmul.f32 0.35355338, %v273_v42 }
 0x246   :  { %v401_v45 = vadd.f32 %v399_v41, %v4071_v38  ;;  %v285_v48 = vadd.f32 %v283_v40, %v4071_v38 }
 0x247   :  { %v400_v46 = vadd.f32 %v398_v44, %v4076_v39  ;;  %v284_v55 = vadd.f32 %v282_v53, %v4076_v39 }
 0x248   :  { %v405_v47 = vsel %vm286_vm12, %v401_v45, -inf  ;;  %v290_v52 = vsel %vm286_vm12, %v285_v48, -inf }
 0x249   :  { %406 = vmax.xlane.f32.xlu1 %v405_v47  ;;  %v402_v49 = vsel %vm286_vm12, %v400_v46, -inf  ;;  %v287_v57 = vsel %vm286_vm12, %v284_v55, -inf }
 0x24a   :  { %403 = vmax.xlane.f32.xlu0 %v402_v49 }
 0x24b   :  { %v3248_v50 = vpop.f32.mrb[2].mxu0 }
 0x24c   :  { %v682_v51 = vpop.f32.mrb[3].mxu0  ;;  %v692_v54 = vmul.f32 0.35355338, %v3248_v50 }
 0x24d   :  { %291 = vmax.xlane.f32.xlu1 %v290_v52  ;;  %v691_v56 = vmul.f32 0.35355338, %v682_v51 }
 0x24e   :  { %v694_v58 = vadd.f32 %v692_v54, %v4071_v38 }
 0x24f   :  { %v693_v60 = vadd.f32 %v691_v56, %v4076_v39 }
 0x250   :  { %v698_v59 = vsel %vm286_vm12, %v694_v58, -inf }
 0x251   :  { %v695_v61 = vsel %vm286_vm12, %v693_v60, -inf }
 0x25e   :  { %425 = vrot.lane.b32.xlu1 %v4017_v22, %s3864_s21 }
 0x260   :  { %310 = vrot.lane.b32.xlu0 %v4015_v21, %s3864_s21 }
 0x282   :  { %288 = vmax.xlane.f32.xlu1 %v287_v57 }
 0x286   :  { %699 = vmax.xlane.f32.xlu1 %v698_v59 }
 0x28a   :  { %696 = vmax.xlane.f32.xlu1 %v695_v61 }
 0x29b   :  { %718 = vrot.lane.b32.xlu1 %v4006_v15, %s3864_s21 }
 0x2d6   :  { %v407_v62 = vpop.xlane.xlu1 %406 }
 0x2d7   :  { %v409_v63 = vsub.f32 %v401_v45, %v407_v62  ;;  %v404_v10 = vpop.xlane.xlu0 %403 }
 0x2d8   :  { %v408_v12 = vsub.f32 %v400_v46, %v404_v10 }
 0x2d9   :  { %v412_v0 = vmul.f32 1.442695, %v409_v63 }
 0x2da   :  { %v292_v1 = vpop.xlane.xlu1 %291  ;;  %v410_v14 = vmul.f32 1.442695, %v408_v12 }
 0x2db   :  { %3750 = vpow2.f32 %v412_v0  ;;  %v294_v9 = vsub.f32 %v285_v48, %v292_v1  ;;  %v4117_v45 = vpop.permute.xlu0 %310 }
 0x2dc   :  { %v313_v48 = vmul.f32 %v4117_v45, %v4019_v23  ;;  %v314_v49 = vmul.f32 %v4117_v45, %v4013_v19 }
 0x2dd   :  { %v297_v13 = vmul.f32 1.442695, %v294_v9 }
 0x2de   :  { %v4096_v2 = vpop.permute.xlu1 %425  ;;  %v3710_v51 = vpack.i.bf16 %v314_v49, %v313_v48 }
 0x2df   :  { %v428_v3 = vmul.f32 %v4096_v2, %v4019_v23  ;;  %v429_v4 = vmul.f32 %v4096_v2, %v4013_v19  ;;  %3752 = vpow2.f32 %v297_v13 }
 0x2e0   :  { %3754 = vpow2.f32 %v410_v14 }
 0x2e1   :  { %v3705_v5 = vpack.i.bf16 %v429_v4, %v428_v3 }
 0x2e3   :  { %3706 = vrot.lane.b32.xlu1 %v3705_v5, %s3864_s21 }
 0x2e5   :  { %v3751_v6 = vpop.eup %3750 }
 0x2e6   :  { %v417_v7 = vsel %vm286_vm12, %v3751_v6, 0.0 }
 0x2e7   :  { %418 = vadd.xlane.f32.xlu0 %v417_v7 }
 0x2e9   :  { %v4104_v17 = vpop.eup %3752 }
 0x2ea   :  { %v302_v18 = vsel %vm286_vm12, %v4104_v17, 0.0  ;;  %v3755_v20 = vpop.eup %3754 }
 0x2eb   :  { %v414_v24 = vsel %vm286_vm12, %v3755_v20, 0.0 }
 0x307   :  { %303 = vadd.xlane.f32.xlu1 %v302_v18 }
 0x30b   :  { %415 = vadd.xlane.f32.xlu1 %v414_v24 }
 0x30f   :  { %v289_v25 = vpop.xlane.xlu1 %288 }
 0x310   :  { %v293_v26 = vsub.f32 %v284_v55, %v289_v25 }
 0x312   :  { %v295_v27 = vmul.f32 1.442695, %v293_v26 }
 0x313   :  { %v700_v28 = vpop.xlane.xlu1 %699 }
 0x314   :  { %3756 = vpow2.f32 %v295_v27  ;;  %v702_v29 = vsub.f32 %v694_v58, %v700_v28  ;;  %v814_v28 = vmul.f32 %v4008_v16, %v4019_v23 }
 0x316   :  { %v705_v32 = vmul.f32 1.442695, %v702_v29 }
 0x317   :  { %v697_v33 = vpop.xlane.xlu1 %696 }
 0x318   :  { %3758 = vpow2.f32 %v705_v32  ;;  %v701_v34 = vsub.f32 %v693_v60, %v697_v33 }
 0x31a   :  { %v703_v35 = vmul.f32 1.442695, %v701_v34 }
 0x31b   :  { %v4115_v44 = vpop.permute.xlu1 %718 }
 0x31c   :  { %3760 = vpow2.f32 %v703_v35  ;;  %v721_v46 = vmul.f32 %v4115_v44, %v4019_v23  ;;  %v722_v47 = vmul.f32 %v4115_v44, %v4013_v19 }
 0x31e   :  { %v3757_v36 = vpop.eup %3756  ;;  %v3715_v50 = vpack.i.bf16 %v722_v47, %v721_v46 }
 0x31f   :  { %v299_v37 = vsel %vm286_vm12, %v3757_v36, 0.0 }
 0x320   :  { %300 = vadd.xlane.f32.xlu1 %v299_v37 }
 0x322   :  { %v4110_v40 = vpop.eup %3758 }
 0x323   :  { %v710_v41 = vsel %vm286_vm12, %v4110_v40, 0.0 }
 0x324   :  { %711 = vadd.xlane.f32.xlu0 %v710_v41 }
 0x326   :  { %v3761_v42 = vpop.eup %3760 }
 0x327   :  { %v707_v43 = vsel %vm286_vm12, %v3761_v42, 0.0 }
 0x328   :  { %708 = vadd.xlane.f32.xlu1 %v707_v43 }
 0x339   :  { %3716 = vrot.lane.b32.xlu1 %v3715_v50, %s3864_s21 }
 0x33a   :  { %3711 = vrot.lane.b32.xlu0 %v3710_v51, %s3864_s21 }
 0x355   :  { %v3707_v52 = vpop.permute.xlu1 %3706 }
 0x356   :  { %v3709_v53 = vunpack.i.h.bf16 %v3707_v52  ;;  %v3708_v54 = vunpack.i.l.bf16 %v3707_v52 }
 0x358   :  { %v3493_v55 = vpack.c.bf16 %v3709_v53, %v3708_v54 }
 0x35a   :  { %3494 = vmatprep.subr.bf16.mxu1 %v3493_v55 }
 0x35b   :  { %3496 = vmatpush3.bf16.msra.mxu1 %v3493_v55 }
 0x374   :  { %v419_v57 = vpop.xlane.xlu0 %418 }
 0x375   :  { %3762 = vrcp.f32 %v419_v57  ;;  %v1021_v57 = vld [vmem:[%s4611_s5 + $0x8] sm:$0xff] }
 0x37f   :  { %v3763_v59 = vpop.eup %3762 }
 0x380   :  { %v423_v62 = vmul.f32 %v3763_v59, %v3751_v6 }
 0x394   :  { %v304_v56 = vpop.xlane.xlu1 %303 }
 0x398   :  { %v416_v58 = vpop.xlane.xlu1 %415 }
 0x399   :  { %3764 = vrcp.f32 %v416_v58  ;;  %v1022_v58 = vld [vmem:[%s4611_s5 + $0x10] sm:$0xff] }
 0x3a3   :  { %v3765_v60 = vpop.eup %3764 }
 0x3a4   :  { %v422_v61 = vmul.f32 %v3765_v60, %v3755_v20 }
 0x3a6   :  { %3232 = vmatprep.mubr.msk.f32.mxu1 %vm286_vm12, %v422_v61 }
 0x3a7   :  { %3233 = vmatmul.mubr.msk.f32.vlgmr.msra.gmra.mrb[4].mxu1 %vm286_vm12, %v423_v62 }
 0x3ad   :  { %v301_v63 = vpop.xlane.xlu1 %300 }
 0x3ae   :  { %3766 = vrcp.f32 %v301_v63 }
 0x3af   :  { %3768 = vrcp.f32 %v304_v56  ;;  %v1020_v56 = vld [vmem:[%s4611_s5] sm:$0xff] }
 0x3b0   :  { %v3521_v59 = vpack.c.bf16 %v1021_v57, %v1020_v56  ;;  %v1260_v56 = vld [vmem:[%s4617_s11 + $0x38] sm:$0xff] }
 0x3b1   :  { %v712_v0 = vpop.xlane.xlu0 %711 }
 0x3b2   :  { %3522 = vmatprep.subr.bf16.mxu0 %v3521_v59 }
 0x3b3   :  { %3524 = vmatpush3.bf16.msra.mxu0 %v3521_v59  ;;  %v1262_v59 = vld [vmem:[%s4617_s11 + $0x48] sm:$0xff] }
 0x3b5   :  { %v3712_v1 = vpop.permute.xlu0 %3711  ;;  %v709_v3 = vpop.xlane.xlu1 %708 }
 0x3b6   :  { %v3714_v4 = vunpack.i.h.bf16 %v3712_v1  ;;  %v3713_v5 = vunpack.i.l.bf16 %v3712_v1  ;;  %3770 = vrcp.f32 %v709_v3 }
 0x3b7   :  { %3772 = vrcp.f32 %v712_v0 }
 0x3b8   :  { %v3767_v7 = vpop.eup %3766  ;;  %v3497_v9 = vpack.c.bf16 %v3714_v4, %v3713_v5 }
 0x3b9   :  { %v3769_v10 = vpop.eup %3768  ;;  %v3717_v12 = vpop.permute.xlu1 %3716  ;;  %v307_v13 = vmul.f32 %v3767_v7, %v3757_v36 }
 0x3ba   :  { %v3719_v6 = vunpack.i.h.bf16 %v3717_v12  ;;  %v3718_v14 = vunpack.i.l.bf16 %v3717_v12  ;;  %3498 = vmatprep.subr.bf16.mxu1 %v3497_v9  ;;  %v308_v18 = vmul.f32 %v3769_v10, %v4104_v17  ;;  %v815_v17 = vmul.f32 %v4008_v16, %v4013_v19  ;;  %v2964_v12 = vld [vmem:[%s4612_s6] ss:$0 sm:$0xff] }
 0x3bb   :  { %3500 = vmatpush3.bf16.msra.mxu1 %v3497_v9  ;;  %3239 = vmatprep.mubr.msk.f32.mxu1 %vm286_vm12, %v307_v13 }
 0x3bc   :  { %v3507_v20 = vpack.c.bf16 %v3719_v6, %v3718_v14 }
 0x3be   :  { %3240 = vmatmul.mubr.msk.f32.vlgmr.msra.gmra.mrb[4].mxu1 %vm286_vm12, %v308_v18  ;;  %3508 = vmatprep.subr.bf16.mxu1 %v3507_v20 }
 0x3bf   :  { %3510 = vmatpush3.bf16.msra.mxu1 %v3507_v20 }
 0x3c0   :  { %v3771_v24 = vpop.eup %3770  ;;  %3513 = vmatprep.subr.msk.bf16.mxu1 %vm4032_vm11, %v4036_v31 }
 0x3c1   :  { %v3773_v25 = vpop.eup %3772  ;;  %v715_v26 = vmul.f32 %v3771_v24, %v3761_v42 }
 0x3c2   :  { %v716_v27 = vmul.f32 %v3773_v25, %v4110_v40 }
 0x3c3   :  { %3253 = vmatprep.mubr.msk.f32.mxu1 %vm286_vm12, %v715_v26 }
 0x3c6   :  { %3254 = vmatmul.mubr.msk.f32.vlgmr.msra.gmra.mrb[4].mxu1 %vm286_vm12, %v716_v27 }
 0x3c7   :  { %3260 = vmatprep.mubr.msk.f32.mxu1 %vm107_vm0, %v814_v28 }
 0x3c8   :  { %3516 = vmatpush3.bf16.xpose.msk.msra.mxu1 %vm4032_vm11, %v4036_v31 }
 0x3cf   :  { %3261 = vmatmul.mubr.msk.f32.vlgmr.msra.gmra.mrb[6].mxu1 %vm107_vm0, %v815_v17 }
 0x4a2   :  { %v3262_v29 = vpop.f32.mrb[6].mxu1 }
 0x4a3   :  { %v898_v32 = vmul.f32 0.35355338, %v3262_v29  ;;  %v888_v33 = vpop.f32.mrb[7].mxu1 }
 0x4a4   :  { %v897_v34 = vmul.f32 0.35355338, %v888_v33 }
 0x4a5   :  { %v900_v35 = vadd.f32 %v898_v32, %v4071_v38 }
 0x4a6   :  { %v899_v36 = vadd.f32 %v897_v34, %v4076_v39 }
 0x4a7   :  { %v904_v37 = vsel %vm286_vm12, %v900_v35, -inf }
 0x4a8   :  { %905 = vmax.xlane.f32.xlu0 %v904_v37  ;;  %v901_v40 = vsel %vm286_vm12, %v899_v36, -inf  ;;  %v1160_v37 = vld [vmem:[%s4615_s9 + $0x8] sm:$0xff] }
 0x4a9   :  { %902 = vmax.xlane.f32.xlu1 %v901_v40 }
 0x4be   :  { %924 = vrot.lane.b32.xlu0 %v4008_v16, %s3864_s21 }
 0x535   :  { %v906_v31 = vpop.xlane.xlu0 %905 }
 0x536   :  { %v908_v41 = vsub.f32 %v900_v35, %v906_v31  ;;  %v903_v42 = vpop.xlane.xlu1 %902  ;;  %v1161_v31 = vld [vmem:[%s4615_s9 + $0x10] sm:$0xff] }
 0x537   :  { %v907_v43 = vsub.f32 %v899_v36, %v903_v42  ;;  %v1159_v36 = vld [vmem:[%s4615_s9] sm:$0xff] }
 0x538   :  { %v911_v46 = vmul.f32 1.442695, %v908_v41  ;;  %v3529_v40 = vpack.c.bf16 %v1160_v37, %v1159_v36  ;;  %v1162_v41 = vld [vmem:[%s4615_s9 + $0x18] sm:$0xff]  ;;  %v2972_v36 = vld [vmem:[%s4618_s12] ss:$0 sm:$0xff] }
 0x539   :  { %v909_v47 = vmul.f32 1.442695, %v907_v43  ;;  %v4157_v52 = vpop.permute.xlu0 %924  ;;  %v3533_v42 = vpack.c.bf16 %v1162_v41, %v1161_v31  ;;  %v1253_v43 = vld [vmem:[%s4617_s11] sm:$0xff] }
 0x53a   :  { %3774 = vpow2.f32 %v911_v46  ;;  %v927_v53 = vmul.f32 %v4157_v52, %v4019_v23  ;;  %v928_v54 = vmul.f32 %v4157_v52, %v4013_v19  ;;  %v1023_v19 = vld [vmem:[%s4611_s5 + $0x18] sm:$0xff]  ;;  %v1254_v46 = vld [vmem:[%s4617_s11 + $0x8] sm:$0xff] }
 0x53b   :  { %3776 = vpow2.f32 %v909_v47  ;;  %v3525_v23 = vpack.c.bf16 %v1023_v19, %v1022_v58  ;;  %v1255_v47 = vld [vmem:[%s4617_s11 + $0x10] sm:$0xff]  ;;  %v1261_v58 = vld [vmem:[%s4617_s11 + $0x40] sm:$0xff] }
 0x53c   :  { %v3720_v55 = vpack.i.bf16 %v928_v54, %v927_v53  ;;  %v1258_v53 = vld [vmem:[%s4617_s11 + $0x28] sm:$0xff]  ;;  %v3553_v19 = vpack.c.bf16 %v1262_v59, %v1261_v58  ;;  %v2975_v59 = vld [vmem:[%s4637_s23 + $0x20] sm:$0xff] }
 0x53d   :  { %3526 = vmatprep.subr.bf16.mxu0 %v3525_v23 }
 0x53e   :  { %3528 = vmatpush3.bf16.msra.mxu0 %v3525_v23  ;;  %v1263_v23 = vld [vmem:[%s4617_s11 + $0x50] sm:$0xff] }
 0x53f   :  { %3530 = vmatprep.subr.bf16.mxu0 %v3529_v40 }
 0x544   :  { %v3775_v48 = vpop.eup %3774 }
 0x545   :  { %v916_v49 = vsel %vm286_vm12, %v3775_v48, 0.0  ;;  %v3777_v50 = vpop.eup %3776 }
 0x546   :  { %917 = vadd.xlane.f32.xlu1 %v916_v49  ;;  %v913_v51 = vsel %vm286_vm12, %v3777_v50, 0.0  ;;  %v1256_v49 = vld [vmem:[%s4617_s11 + $0x18] sm:$0xff] }
 0x54a   :  { %914 = vadd.xlane.f32.xlu1 %v913_v51  ;;  %v1257_v51 = vld [vmem:[%s4617_s11 + $0x20] sm:$0xff] }
 0x54b   :  { %v3545_v54 = vpack.c.bf16 %v1258_v53, %v1257_v51 }
 0x55b   :  { %3721 = vrot.lane.b32.xlu1 %v3720_v55, %s3864_s21  ;;  %v1259_v55 = vld [vmem:[%s4617_s11 + $0x30] sm:$0xff] }
 0x55c   :  { %v3549_v57 = vpack.c.bf16 %v1260_v56, %v1259_v55 }
 0x5d3   :  { %v918_v60 = vpop.xlane.xlu1 %917 }
 0x5d4   :  { %3778 = vrcp.f32 %v918_v60  ;;  %v1264_v60 = vld [vmem:[%s4617_s11 + $0x58] sm:$0xff] }
 0x5d7   :  { %v915_v61 = vpop.xlane.xlu1 %914 }
 0x5d8   :  { %3780 = vrcp.f32 %v915_v61  ;;  %v3557_v61 = vpack.c.bf16 %v1264_v60, %v1263_v23  ;;  %v2977_v60 = vld [vmem:[%s4637_s23 + $0x30] sm:$0xff] }
 0x5db   :  { %v3722_v62 = vpop.permute.xlu1 %3721 }
 0x5dc   :  { %v3724_v63 = vunpack.i.h.bf16 %v3722_v62  ;;  %v3723_v0 = vunpack.i.l.bf16 %v3722_v62  ;;  %v1265_v62 = vld [vmem:[%s4617_s11 + $0x60] sm:$0xff] }
 0x5de   :  { %v3517_v1 = vpack.c.bf16 %v3724_v63, %v3723_v0  ;;  %v3779_v3 = vpop.eup %3778  ;;  %v1266_v63 = vld [vmem:[%s4617_s11 + $0x68] sm:$0xff] }
 0x5df   :  { %v922_v7 = vmul.f32 %v3779_v3, %v3775_v48  ;;  %v3537_v48 = vpack.c.bf16 %v1254_v46, %v1253_v43  ;;  %v3561_v0 = vpack.c.bf16 %v1266_v63, %v1265_v62 }
 0x5e0   :  { %3518 = vmatprep.subr.bf16.mxu1 %v3517_v1 }
 0x5e1   :  { %3520 = vmatpush3.bf16.msra.mxu1 %v3517_v1 }
 0x5e2   :  { %v3781_v4 = vpop.eup %3780  ;;  %3538 = vmatprep.subr.bf16.mxu1 %v3537_v48 }
 0x5e3   :  { %v921_v5 = vmul.f32 %v3781_v4, %v3777_v50  ;;  %v3541_v50 = vpack.c.bf16 %v1256_v49, %v1255_v47 }
 0x5e5   :  { %3267 = vmatprep.mubr.msk.f32.mxu1 %vm286_vm12, %v921_v5 }
 0x5e6   :  { %3268 = vmatmul.mubr.msk.f32.vlgmr.msra.gmra.mrb[4].mxu1 %vm286_vm12, %v922_v7 }
 0x5e7   :  { %3540 = vmatpush3.bf16.msra.mxu1 %v3537_v48 }
 0x5e8   :  { %3542 = vmatprep.subr.bf16.mxu1 %v3541_v50 }
 0x5eb   :  { %3544 = vmatpush3.bf16.msra.mxu1 %v3541_v50 }
 0x5ec   :  { %3546 = vmatprep.subr.bf16.mxu1 %v3545_v54 }
 0x5ef   :  { %3548 = vmatpush3.bf16.msra.mxu1 %v3545_v54 }
 0x5f0   :  { %3550 = vmatprep.subr.bf16.mxu1 %v3549_v57 }
 0x5f3   :  { %3552 = vmatpush3.bf16.msra.mxu1 %v3549_v57 }
 0x5f4   :  { %3554 = vmatprep.subr.bf16.mxu1 %v3553_v19 }
 0x5f7   :  { %3556 = vmatpush3.bf16.msra.mxu1 %v3553_v19  ;;  %v2976_v19 = vld [vmem:[%s4637_s23 + $0x28] sm:$0xff] }
 0x5f8   :  { %3558 = vmatprep.subr.bf16.mxu1 %v3557_v61  ;;  %v3569_v23 = vpack.c.bf16 %v2976_v19, %v2975_v59 }
 0x5fb   :  { %3560 = vmatpush3.bf16.msra.mxu1 %v3557_v61  ;;  %v2978_v61 = vld [vmem:[%s4637_s23 + $0x38] sm:$0xff] }
 0x5fc   :  { %3562 = vmatprep.subr.bf16.mxu1 %v3561_v0  ;;  %v3573_v62 = vpack.c.bf16 %v2978_v61, %v2977_v60 }
 0x5ff   :  { %3564 = vmatpush3.bf16.msra.mxu1 %v3561_v0 }
 0x6b9   :  { %v3269_v9 = vpop.f32.mrb[4].mxu1 }
 0x6ba   :  { %v1009_v10 = vpop.f32.mrb[5].mxu1 }
 0x6bb   :  { %3278 = vmatprep.mubr.msk.f32.mxu0 %vm107_vm0, %v1009_v10 }
 0x6bc   :  { %3279 = vmatmul.mubr.msk.f32.vlgmr.msra.gmra.mrb[4].mxu0 %vm107_vm0, %v3269_v9 }
 0x6bd   :  { %3532 = vmatpush3.bf16.msra.mxu0 %v3529_v40 }
 0x6be   :  { %3534 = vmatprep.subr.bf16.mxu0 %v3533_v42 }
 0x6c1   :  { %3536 = vmatpush3.bf16.msra.mxu0 %v3533_v42 }
 0x6c2   :  { %3570 = vmatprep.subr.bf16.mxu0 %v3569_v23 }
 0x78f   :  { %v3280_v13 = vpop.f32.mrb[4].mxu0 }
 0x790   :  { %v1109_v6 = vadd.f32 %v3280_v13, %v2964_v12  ;;  %v1103_v14 = vpop.f32.mrb[5].mxu0 }
 0x791   :  { %v1104_v18 = vadd.f32 %v2964_v12, %v1103_v14  ;;  %v2967_v12 = vld [vmem:[%s4613_s7] ss:$0 sm:$0xff] }
 0x792   :  { %v1113_v20 = vadd.f32 %v1109_v6, %v4002_v11  ;;  %v2968_v6 = vld [vmem:[%s4614_s8] ss:$0 sm:$0xff] }
 0x793   :  { %v1112_v24 = vadd.f32 %v1104_v18, %v3992_v8 }
 0x794   :  { %v1119_v25 = vsel %vm107_vm0, %v1113_v20, 0.0 }
 0x795   :  { %1120 = vadd.xlane.f32.xlu1 %v1119_v25  ;;  %v1116_v26 = vsel %vm107_vm0, %v1112_v24, 0.0 }
 0x796   :  { %1117 = vadd.xlane.f32.xlu0 %v1116_v26 }
 0x822   :  { %v1121_v27 = vpop.xlane.xlu1 %1120 }
 0x823   :  { %v1124_v28 = vmul.f32 0.03125, %v1121_v27  ;;  %v1118_v17 = vpop.xlane.xlu0 %1117  ;;  %v1267_v27 = vld [vmem:[%s4617_s11 + $0x70] sm:$0xff] }
 0x824   :  { %v1123_v29 = vmul.f32 0.03125, %v1118_v17 }
 0x825   :  { %v4187_v32 = vsub.f32 %v1113_v20, %v1124_v28  ;;  %v1268_v28 = vld [vmem:[%s4617_s11 + $0x78] sm:$0xff] }
 0x826   :  { %v1125_v33 = vsub.f32 %v1112_v24, %v1123_v29  ;;  %v3565_v17 = vpack.c.bf16 %v1268_v28, %v1267_v27  ;;  %v2969_v29 = vld [vmem:[%s4616_s10] ss:$0 sm:$0xff] }
 0x827   :  { %v1128_v11 = vmul.f32 %v4187_v32, %v4187_v32 }
 0x828   :  { %v1127_v34 = vmul.f32 %v1125_v33, %v1125_v33  ;;  %3566 = vmatprep.subr.bf16.mxu1 %v3565_v17 }
 0x829   :  { %v1132_v8 = vsel %vm107_vm0, %v1128_v11, 0.0  ;;  %3568 = vmatpush3.bf16.msra.mxu1 %v3565_v17 }
 0x82a   :  { %v1129_v35 = vsel %vm107_vm0, %v1127_v34, 0.0 }
 0x82b   :  { %1130 = vadd.xlane.f32.xlu0 %v1129_v35 }
 0x82f   :  { %1133 = vadd.xlane.f32.xlu0 %v1132_v8 }
 0x8b8   :  { %v1131_v1 = vpop.xlane.xlu0 %1130 }
 0x8b9   :  { %v1135_v3 = vmul.f32 0.03125, %v1131_v1 }
 0x8bb   :  { %v1137_v4 = vadd.f32 1e-05, %v1135_v3 }
 0x8bc   :  { %v1134_v5 = vpop.xlane.xlu0 %1133 }
 0x8bd   :  { %3782 = vrsqrt.f32 %v1137_v4  ;;  %v1136_v7 = vmul.f32 0.03125, %v1134_v5 }
 0x8bf   :  { %v1138_v9 = vadd.f32 1e-05, %v1136_v7 }
 0x8c1   :  { %3784 = vrsqrt.f32 %v1138_v9  ;;  %v2973_v9 = vld [vmem:[%s4619_s13] ss:$0 sm:$0xff] }
 0x8c7   :  { %v3783_v10 = vpop.eup %3782 }
 0x8c8   :  { %v1141_v13 = vmul.f32 %v3783_v10, %v1125_v33 }
 0x8ca   :  { %v1149_v14 = vmul.f32 %v2967_v12, %v1141_v13 }
 0x8cb   :  { %v3785_v18 = vpop.eup %3784 }
 0x8cc   :  { %v1142_v20 = vmul.f32 %v3785_v18, %v4187_v32  ;;  %v1157_v24 = vadd.f32 %v2968_v6, %v1149_v14 }
 0x8ce   :  { %v1150_v25 = vmul.f32 %v2967_v12, %v1142_v20  ;;  %3289 = vmatprep.mubr.msk.f32.mxu0 %vm107_vm0, %v1157_v24 }
 0x8d0   :  { %v1158_v26 = vadd.f32 %v2968_v6, %v1150_v25  ;;  %v2974_v6 = vld [vmem:[%s4620_s14] ss:$0 sm:$0xff]  ;;  %v2980_v25 = vld [vmem:[%s4640_s26 + $0x1] ss:$0 sm:$0xff] }
 0x8d2   :  { %3290 = vmatmul.mubr.msk.f32.vlgmr.msra.gmra.mrb[6].mxu0 %vm107_vm0, %v1158_v26 }
 0x8d3   :  { %3572 = vmatpush3.bf16.msra.mxu0 %v3569_v23 }
 0x8d4   :  { %3574 = vmatprep.subr.bf16.mxu0 %v3573_v62 }
 0x8d7   :  { %3576 = vmatpush3.bf16.msra.mxu0 %v3573_v62 }
 0x9a5   :  { %v3291_v32 = vpop.f32.mrb[6].mxu0 }
 0x9a6   :  { %v1248_v33 = vadd.f32 %v3291_v32, %v2969_v29  ;;  %v1242_v34 = vpop.f32.mrb[7].mxu0 }
 0x9a7   :  { %v1243_v35 = vadd.f32 %v2969_v29, %v1242_v34 }
 0x9a8   :  { %v1252_v8 = vmax.f32 %v1248_v33, 0.0 }
 0x9a9   :  { %v1251_v11 = vmax.f32 %v1243_v35, 0.0 }
 0x9ab   :  { %3324 = vmatprep.mubr.f32.mxu1 %v1251_v11 }
 0x9ac   :  { %3325 = vmatmul.mubr.f32.vlgmr.msra.gmra.mrb[8].mxu1 %v1252_v8 }
 0xa7f   :  { %v3326_v37 = vpop.f32.mrb[8].mxu1 }
 0xa80   :  { %v1348_v40 = vadd.f32 %v3326_v37, %v2972_v36  ;;  %v1342_v31 = vpop.f32.mrb[9].mxu1 }
 0xa81   :  { %v1343_v41 = vadd.f32 %v2972_v36, %v1342_v31 }
 0xa82   :  { %v1352_v42 = vadd.f32 %v1348_v40, %v1158_v26 }
 0xa83   :  { %v1351_v43 = vadd.f32 %v1343_v41, %v1157_v24 }
 0xa84   :  { %v1358_v46 = vsel %vm107_vm0, %v1352_v42, 0.0 }
 0xa85   :  { %1359 = vadd.xlane.f32.xlu1 %v1358_v46  ;;  %v1355_v47 = vsel %vm107_vm0, %v1351_v43, 0.0 }
 0xa86   :  { %1356 = vadd.xlane.f32.xlu0 %v1355_v47 }
 0xb12   :  { %v1360_v48 = vpop.xlane.xlu1 %1359 }
 0xb13   :  { %v1362_v49 = vmul.f32 0.03125, %v1360_v48  ;;  %v1357_v50 = vpop.xlane.xlu0 %1356 }
 0xb14   :  { %v1361_v51 = vmul.f32 0.03125, %v1357_v50 }
 0xb15   :  { %v1364_v53 = vsub.f32 %v1352_v42, %v1362_v49 }
 0xb16   :  { %v1363_v54 = vsub.f32 %v1351_v43, %v1361_v51 }
 0xb17   :  { %v1366_v55 = vmul.f32 %v1364_v53, %v1364_v53 }
 0xb18   :  { %v1365_v56 = vmul.f32 %v1363_v54, %v1363_v54 }
 0xb19   :  { %v1370_v57 = vsel %vm107_vm0, %v1366_v55, 0.0 }
 0xb1a   :  { %1371 = vadd.xlane.f32.xlu1 %v1370_v57  ;;  %v1367_v58 = vsel %vm107_vm0, %v1365_v56, 0.0 }
 0xb1b   :  { %1368 = vadd.xlane.f32.xlu0 %v1367_v58 }
 0xba7   :  { %v1372_v63 = vpop.xlane.xlu1 %1371 }
 0xba8   :  { %v1374_v0 = vmul.f32 0.03125, %v1372_v63  ;;  %v1369_v1 = vpop.xlane.xlu0 %1368 }
 0xba9   :  { %v1373_v3 = vmul.f32 0.03125, %v1369_v1 }
 0xbaa   :  { %v1376_v4 = vadd.f32 1e-05, %v1374_v0 }
 0xbab   :  { %v1375_v5 = vadd.f32 1e-05, %v1373_v3 }
 0xbac   :  { %3786 = vrsqrt.f32 %v1376_v4 }
 0xbad   :  { %3788 = vrsqrt.f32 %v1375_v5 }
 0xbb6   :  { %v3787_v7 = vpop.eup %3786 }
 0xbb7   :  { %v3789_v10 = vpop.eup %3788  ;;  %v1380_v12 = vmul.f32 %v3787_v7, %v1364_v53 }
 0xbb8   :  { %v1379_v13 = vmul.f32 %v3789_v10, %v1363_v54 }
 0xbb9   :  { %v1388_v14 = vmul.f32 %v2973_v9, %v1380_v12 }
 0xbba   :  { %v1387_v18 = vmul.f32 %v2973_v9, %v1379_v13 }
 0xbbb   :  { %v4292_v24 = vadd.f32 %v2974_v6, %v1388_v14 }
 0xbbc   :  { %v4290_v20 = vadd.f32 %v2974_v6, %v1387_v18 }
 0xbbe   :  { %3335 = vmatprep.mubr.msk.f32.mxu0 %vm107_vm0, %v4290_v20 }
 0xbbf   :  { %3336 = vmatmul.mubr.msk.f32.vlgmr.msra.gmra.mrb[8].mxu0 %vm107_vm0, %v4292_v24 }
 0xc92   :  { %v3337_v26 = vpop.f32.mrb[8].mxu0 }
 0xc93   :  { %v1488_v27 = vadd.f32 %v3337_v26, %v2980_v25  ;;  %v1482_v28 = vpop.f32.mrb[9].mxu0 }
 0xc94   :  { %v1483_v17 = vadd.f32 %v2980_v25, %v1482_v28 }
 0xc95   :  { %v4307_v35 = vmul.f32 %v1488_v27, %v4096_v2  ;;  %v4315_v8 = vmul.f32 %v1488_v27, %v4115_v44  ;;  %v4321_v37 = vmul.f32 %v1488_v27, %v4117_v45  ;;  %v4330_v31 = vmul.f32 %v1488_v27, %v4157_v52 }
 0xc96   :  { %v3725_v29 = vpack.i.bf16 %v1488_v27, %v1483_v17  ;;  %v1491_v32 = vmul.f32 %v4015_v21, %v1483_v17  ;;  %v1901_v33 = vmul.f32 %v4006_v15, %v1483_v17  ;;  %v4304_v34 = vmul.f32 %v1483_v17, %v4096_v2 }
 0xc97   :  { %v4310_v11 = vmul.f32 %v1483_v17, %v4115_v44  ;;  %v4318_v36 = vmul.f32 %v1483_v17, %v4117_v45  ;;  %v4327_v40 = vmul.f32 %v1483_v17, %v4157_v52  ;;  %v1492_v52 = vmul.f32 %v4015_v21, %v1488_v27 }
 0xc98   :  { %3726 = vrot.lane.b32.xlu0 %v3725_v29, %s3863_s27  ;;  %3342 = vmatprep.mubr.msk.f32.mxu0 %vm107_vm0, %v1491_v32  ;;  %v3730_v2 = vpack.i.bf16 %v4307_v35, %v4304_v34  ;;  %v1902_v48 = vmul.f32 %v4006_v15, %v1488_v27  ;;  %v1612_v49 = vmul.f32 %v4017_v22, %v1483_v17 }
 0xc99   :  { %3370 = vmatprep.mubr.msk.f32.mxu1 %vm107_vm0, %v1901_v33  ;;  %v3740_v44 = vpack.i.bf16 %v4315_v8, %v4310_v11  ;;  %v3735_v41 = vpack.i.bf16 %v4321_v37, %v4318_v36  ;;  %v3745_v45 = vpack.i.bf16 %v4330_v31, %v4327_v40  ;;  %v2103_v50 = vmul.f32 %v4008_v16, %v1483_v17 }
 0xc9a   :  { %v1613_v15 = vmul.f32 %v4017_v22, %v1488_v27  ;;  %v2104_v21 = vmul.f32 %v4008_v16, %v1488_v27 }
 0xd0a   :  { %v3727_v42 = vpop.permute.xlu0 %3726 }
 0xd0b   :  { %v3729_v43 = vunpack.i.h.bf16 %v3727_v42  ;;  %v3728_v46 = vunpack.i.l.bf16 %v3727_v42 }
 0xd0d   :  { %v3577_v47 = vpack.c.bf16 %v3729_v43, %v3728_v46 }
 0xd0f   :  { %3579 = vmatprep.subr.msk.bf16.mxu0 %vm4032_vm11, %v3577_v47  ;;  %3599 = vmatprep.subr.msk.bf16.mxu1 %vm4032_vm11, %v3577_v47 }
 0xd10   :  { %3582 = vmatpush3.bf16.xpose.msk.msra.mxu0 %vm4032_vm11, %v3577_v47  ;;  %3602 = vmatpush3.bf16.xpose.msk.msra.mxu1 %vm4032_vm11, %v3577_v47 }
 0xd11   :  { %3585 = vmatprep.subr.msk.bf16.mxu0 %vm4032_vm11, %v3577_v47  ;;  %3609 = vmatprep.subr.msk.bf16.mxu1 %vm4032_vm11, %v3577_v47 }
 0xd17   :  { %3343 = vmatmul.mubr.msk.f32.vlgmr.msra.gmra.mrb[10].mxu0 %vm107_vm0, %v1492_v52  ;;  %3371 = vmatmul.mubr.msk.f32.vlgmr.msra.gmra.mrb[10].mxu1 %vm107_vm0, %v1902_v48 }
 0xd18   :  { %3588 = vmatpush3.bf16.xpose.msk.msra.mxu0 %vm4032_vm11, %v3577_v47  ;;  %3349 = vmatprep.mubr.msk.f32.mxu0 %vm107_vm0, %v1612_v49 }
 0xd19   :  { %3612 = vmatpush3.bf16.xpose.msk.msra.mxu1 %vm4032_vm11, %v3577_v47  ;;  %3384 = vmatprep.mubr.msk.f32.mxu1 %vm107_vm0, %v2103_v50 }
 0xd1f   :  { %3350 = vmatmul.mubr.msk.f32.vlgmr.msra.gmra.mrb[12].mxu0 %vm107_vm0, %v1613_v15 }
 0xd20   :  { %3385 = vmatmul.mubr.msk.f32.vlgmr.msra.gmra.mrb[12].mxu1 %vm107_vm0, %v2104_v21 }
 0xdea   :  { %v3344_v51 = vpop.f32.mrb[10].mxu0  ;;  %v3372_v53 = vpop.f32.mrb[10].mxu1 }
 0xdeb   :  { %v1575_v54 = vpop.f32.mrb[11].mxu0  ;;  %v1975_v55 = vpop.f32.mrb[11].mxu1  ;;  %v1585_v0 = vmul.f32 0.35355338, %v3344_v51  ;;  %v1985_v9 = vmul.f32 0.35355338, %v3372_v53 }
 0xdec   :  { %v1584_v22 = vmul.f32 0.35355338, %v1575_v54  ;;  %v1984_v4 = vmul.f32 0.35355338, %v1975_v55 }
 0xded   :  { %v1587_v7 = vadd.f32 %v1585_v0, %v4071_v38  ;;  %v1987_v14 = vadd.f32 %v1985_v9, %v4071_v38 }
 0xdee   :  { %v1586_v3 = vadd.f32 %v1584_v22, %v4076_v39  ;;  %v1986_v12 = vadd.f32 %v1984_v4, %v4076_v39 }
 0xdef   :  { %v1591_v10 = vsel %vm286_vm12, %v1587_v7, -inf  ;;  %v1991_v18 = vsel %vm286_vm12, %v1987_v14, -inf }
 0xdf0   :  { %v1588_v5 = vsel %vm286_vm12, %v1586_v3, -inf  ;;  %v1988_v6 = vsel %vm286_vm12, %v1986_v12, -inf }
 0xdf2   :  { %v3351_v56 = vpop.f32.mrb[12].mxu0 }
 0xdf3   :  { %v1696_v57 = vmul.f32 0.35355338, %v3351_v56  ;;  %v3386_v58 = vpop.f32.mrb[12].mxu1  ;;  %v1686_v59 = vpop.f32.mrb[13].mxu0 }
 0xdf4   :  { %v1695_v30 = vmul.f32 0.35355338, %v1686_v59  ;;  %v2177_v19 = vpop.f32.mrb[13].mxu1  ;;  %v2187_v13 = vmul.f32 0.35355338, %v3386_v58 }
 0xdf5   :  { %v2186_v23 = vmul.f32 0.35355338, %v2177_v19  ;;  %v1698_v60 = vadd.f32 %v1696_v57, %v4071_v38 }
 0xdf6   :  { %v4372_v62 = vadd.f32 %v1695_v30, %v4076_v39  ;;  %v2189_v25 = vadd.f32 %v2187_v13, %v4071_v38 }
 0xdf7   :  { %v1702_v16 = vsel %vm286_vm12, %v1698_v60, -inf  ;;  %v4369_v61 = vadd.f32 %v2186_v23, %v4076_v39 }
 0xdf8   :  { %1703 = vmax.xlane.f32.xlu1 %v1702_v16  ;;  %v1699_v1 = vsel %vm286_vm12, %v4372_v62, -inf  ;;  %v2193_v26 = vsel %vm286_vm12, %v2189_v25, -inf }
 0xdf9   :  { %v2190_v63 = vsel %vm286_vm12, %v4369_v61, -inf }
 0xdfa   :  { %2191 = vmax.xlane.f32.xlu0 %v2190_v63 }
 0xdfc   :  { %1700 = vmax.xlane.f32.xlu1 %v1699_v1 }
 0xe00   :  { %1589 = vmax.xlane.f32.xlu1 %v1588_v5 }
 0xe04   :  { %1592 = vmax.xlane.f32.xlu1 %v1591_v10 }
 0xe08   :  { %1989 = vmax.xlane.f32.xlu1 %v1988_v6 }
 0xe0c   :  { %1992 = vmax.xlane.f32.xlu1 %v1991_v18 }
 0xe10   :  { %3731 = vrot.lane.b32.xlu0 %v3730_v2, %s3864_s21  ;;  %2194 = vmax.xlane.f32.xlu1 %v2193_v26 }
 0xe14   :  { %3741 = vrot.lane.b32.xlu0 %v3740_v44, %s3864_s21 }
 0xe85   :  { %v1704_v39 = vpop.xlane.xlu1 %1703 }
 0xe86   :  { %v1706_v48 = vsub.f32 %v1698_v60, %v1704_v39 }
 0xe87   :  { %v2192_v27 = vpop.xlane.xlu0 %2191 }
 0xe88   :  { %v1709_v21 = vmul.f32 1.442695, %v1706_v48  ;;  %v2196_v0 = vsub.f32 %v4369_v61, %v2192_v27  ;;  %v3010_v48 = vld [vmem:[%s4611_s5 + $0x38] sm:$0xff] }
 0xe89   :  { %v1701_v28 = vpop.xlane.xlu1 %1700 }
 0xe8a   :  { %v1705_v54 = vsub.f32 %v4372_v62, %v1701_v28  ;;  %v2198_v1 = vmul.f32 1.442695, %v2196_v0 }
 0xe8b   :  { %v3732_v17 = vpop.permute.xlu0 %3731 }
 0xe8c   :  { %v3734_v29 = vunpack.i.h.bf16 %v3732_v17  ;;  %v3733_v38 = vunpack.i.l.bf16 %v3732_v17  ;;  %v1707_v58 = vmul.f32 1.442695, %v1705_v54  ;;  %v3012_v54 = vld [vmem:[%s4612_s6 + $0x1] ss:$0 sm:$0xff] }
 0xe8d   :  { %v1590_v32 = vpop.xlane.xlu1 %1589 }
 0xe8e   :  { %v3589_v33 = vpack.c.bf16 %v3734_v29, %v3733_v38  ;;  %v1594_v2 = vsub.f32 %v1586_v3, %v1590_v32 }
 0xe90   :  { %3590 = vmatprep.subr.bf16.mxu0 %v3589_v33  ;;  %v1596_v11 = vmul.f32 1.442695, %v1594_v2  ;;  %v3008_v2 = vld [vmem:[%s4611_s5 + $0x28] sm:$0xff] }
 0xe91   :  { %3592 = vmatpush3.bf16.msra.mxu0 %v3589_v33  ;;  %v1593_v42 = vpop.xlane.xlu1 %1592 }
 0xe92   :  { %v1595_v43 = vsub.f32 %v1587_v7, %v1593_v42 }
 0xe94   :  { %v1598_v34 = vmul.f32 1.442695, %v1595_v43 }
 0xe95   :  { %v1990_v35 = vpop.xlane.xlu1 %1989 }
 0xe96   :  { %3790 = vpow2.f32 %v1598_v34  ;;  %v1994_v8 = vsub.f32 %v1986_v12, %v1990_v35  ;;  %v3007_v35 = vld [vmem:[%s4611_s5 + $0x20] sm:$0xff] }
 0xe98   :  { %v1996_v49 = vmul.f32 1.442695, %v1994_v8  ;;  %v3617_v8 = vpack.c.bf16 %v3008_v2, %v3007_v35 }
 0xe99   :  { %v1993_v46 = vpop.xlane.xlu1 %1992 }
 0xe9a   :  { %v1995_v47 = vsub.f32 %v1987_v14, %v1993_v46  ;;  %v3742_v14 = vpop.permute.xlu0 %3741 }
 0xe9c   :  { %v1998_v44 = vmul.f32 1.442695, %v1995_v47 }
 0xe9d   :  { %v2195_v50 = vpop.xlane.xlu1 %2194 }
 0xe9e   :  { %3792 = vpow2.f32 %v1998_v44  ;;  %v2197_v51 = vsub.f32 %v2189_v25, %v2195_v50  ;;  %v3743_v25 = vunpack.i.l.bf16 %v3742_v14 }
 0xe9f   :  { %3794 = vpow2.f32 %v1596_v11 }
 0xea0   :  { %v4396_v52 = vpop.eup %3790  ;;  %3796 = vpow2.f32 %v1996_v49  ;;  %v2200_v55 = vmul.f32 1.442695, %v2197_v51 }
 0xea1   :  { %v1603_v15 = vsel %vm286_vm12, %v4396_v52, 0.0  ;;  %3798 = vpow2.f32 %v1709_v21 }
 0xea2   :  { %1604 = vadd.xlane.f32.xlu1 %v1603_v15  ;;  %3800 = vpow2.f32 %v2200_v55 }
 0xea3   :  { %3802 = vpow2.f32 %v1707_v58 }
 0xea4   :  { %3804 = vpow2.f32 %v2198_v1 }
 0xea8   :  { %v4400_v53 = vpop.eup %3792 }
 0xea9   :  { %v2003_v56 = vsel %vm286_vm12, %v4400_v53, 0.0  ;;  %v3795_v57 = vpop.eup %3794 }
 0xeaa   :  { %2004 = vadd.xlane.f32.xlu1 %v2003_v56  ;;  %v1600_v59 = vsel %vm286_vm12, %v3795_v57, 0.0  ;;  %v3797_v30 = vpop.eup %3796 }
 0xeab   :  { %v2000_v19 = vsel %vm286_vm12, %v3797_v30, 0.0  ;;  %v3799_v23 = vpop.eup %3798 }
 0xeac   :  { %v1714_v60 = vsel %vm286_vm12, %v3799_v23, 0.0  ;;  %v4408_v22 = vpop.eup %3800 }
 0xead   :  { %v2205_v16 = vsel %vm286_vm12, %v4408_v22, 0.0  ;;  %v3803_v62 = vpop.eup %3802 }
 0xeae   :  { %1601 = vadd.xlane.f32.xlu1 %v1600_v59  ;;  %v1711_v63 = vsel %vm286_vm12, %v3803_v62, 0.0  ;;  %v4418_v3 = vpop.eup %3804 }
 0xeaf   :  { %v2202_v4 = vsel %vm286_vm12, %v4418_v3, 0.0 }
 0xeb2   :  { %2001 = vadd.xlane.f32.xlu1 %v2000_v19 }
 0xeb6   :  { %1715 = vadd.xlane.f32.xlu1 %v1714_v60 }
 0xeba   :  { %2206 = vadd.xlane.f32.xlu1 %v2205_v16 }
 0xebe   :  { %1712 = vadd.xlane.f32.xlu1 %v1711_v63 }
 0xecf   :  { %3736 = vrot.lane.b32.xlu1 %v3735_v41, %s3864_s21 }
 0xef3   :  { %2203 = vadd.xlane.f32.xlu1 %v2202_v4  ;;  %v3019_v4 = vld [vmem:[%s4615_s9 + $0x20] sm:$0xff] }
 0xf04   :  { %3746 = vrot.lane.b32.xlu1 %v3745_v45, %s3864_s21  ;;  %v3744_v45 = vunpack.i.h.bf16 %v3742_v14  ;;  %v3031_v14 = vld [vmem:[%s4617_s11 + $0xa0] sm:$0xff] }
 0xf06   :  { %v3603_v28 = vpack.c.bf16 %v3744_v45, %v3743_v25  ;;  %v3034_v45 = vld [vmem:[%s4617_s11 + $0xb8] sm:$0xff] }
 0xf2f   :  { %v1605_v5 = vpop.xlane.xlu1 %1604 }
 0xf37   :  { %v2005_v7 = vpop.xlane.xlu1 %2004 }
 0xf3b   :  { %v1602_v9 = vpop.xlane.xlu1 %1601 }
 0xf3c   :  { %3806 = vrcp.f32 %v1602_v9  ;;  %v3021_v9 = vld [vmem:[%s4615_s9 + $0x30] sm:$0xff] }
 0xf3f   :  { %v2002_v36 = vpop.xlane.xlu1 %2001 }
 0xf43   :  { %v1716_v37 = vpop.xlane.xlu1 %1715 }
 0xf44   :  { %3808 = vrcp.f32 %v1716_v37 }
 0xf46   :  { %v3807_v18 = vpop.eup %3806 }
 0xf47   :  { %v2207_v41 = vpop.xlane.xlu1 %2206  ;;  %v1608_v27 = vmul.f32 %v3807_v18, %v3795_v57  ;;  %v3032_v18 = vld [vmem:[%s4617_s11 + $0xa8] sm:$0xff] }
 0xf4b   :  { %v1713_v61 = vpop.xlane.xlu1 %1712 }
 0xf4c   :  { %3810 = vrcp.f32 %v1713_v61  ;;  %v3028_v61 = vld [vmem:[%s4617_s11 + $0x88] sm:$0xff] }
 0xf4d   :  { %3812 = vrcp.f32 %v1605_v5  ;;  %v3020_v5 = vld [vmem:[%s4615_s9 + $0x28] sm:$0xff] }
 0xf4e   :  { %3814 = vrcp.f32 %v2002_v36  ;;  %v3809_v40 = vpop.eup %3808  ;;  %v3022_v36 = vld [vmem:[%s4615_s9 + $0x38] sm:$0xff] }
 0xf4f   :  { %v3737_v10 = vpop.permute.xlu1 %3736  ;;  %v1720_v39 = vmul.f32 %v3809_v40, %v3799_v23  ;;  %3816 = vrcp.f32 %v2005_v7  ;;  %v3625_v7 = vpack.c.bf16 %v3020_v5, %v3019_v4  ;;  %v3629_v37 = vpack.c.bf16 %v3022_v36, %v3021_v9 }
 0xf50   :  { %v3739_v12 = vunpack.i.h.bf16 %v3737_v10  ;;  %v3738_v13 = vunpack.i.l.bf16 %v3737_v10  ;;  %3818 = vrcp.f32 %v2207_v41  ;;  %v3027_v41 = vld [vmem:[%s4617_s11 + $0x80] sm:$0xff]  ;;  %v3029_v10 = vld [vmem:[%s4617_s11 + $0x90] sm:$0xff]  ;;  %v3641_v40 = vpack.c.bf16 %v3032_v18, %v3031_v14  ;;  %v2694_v14 = vld [vmem:[%s4621_s15 + $0x18] sm:$0xff] }
 0xf51   :  { %3626 = vmatprep.subr.bf16.mxu1 %v3625_v7 }
 0xf52   :  { %v3593_v6 = vpack.c.bf16 %v3739_v12, %v3738_v13  ;;  %3628 = vmatpush3.bf16.msra.mxu1 %v3625_v7  ;;  %v3633_v12 = vpack.c.bf16 %v3028_v61, %v3027_v41  ;;  %v3030_v13 = vld [vmem:[%s4617_s11 + $0x98] sm:$0xff] }
 0xf53   :  { %3630 = vmatprep.subr.bf16.mxu1 %v3629_v37 }
 0xf54   :  { %3594 = vmatprep.subr.bf16.mxu0 %v3593_v6 }
 0xf56   :  { %v3811_v31 = vpop.eup %3810  ;;  %3632 = vmatpush3.bf16.msra.mxu1 %v3629_v37 }
 0xf57   :  { %v1719_v26 = vmul.f32 %v3811_v31, %v3803_v62  ;;  %v3813_v17 = vpop.eup %3812  ;;  %v3033_v31 = vld [vmem:[%s4617_s11 + $0xb0] sm:$0xff] }
 0xf58   :  { %v3815_v29 = vpop.eup %3814  ;;  %v1609_v38 = vmul.f32 %v3813_v17, %v4396_v52  ;;  %v3009_v52 = vld [vmem:[%s4611_s5 + $0x30] sm:$0xff]  ;;  %v3645_v25 = vpack.c.bf16 %v3034_v45, %v3033_v31  ;;  %v3038_v17 = vld [vmem:[%s4617_s11 + $0xd8] sm:$0xff] }
 0xf59   :  { %3356 = vmatprep.mubr.msk.f32.mxu0 %vm286_vm12, %v1719_v26  ;;  %v2008_v32 = vmul.f32 %v3815_v29, %v3797_v30  ;;  %v3817_v33 = vpop.eup %3816  ;;  %v3621_v21 = vpack.c.bf16 %v3010_v48, %v3009_v52  ;;  %v3035_v26 = vld [vmem:[%s4617_s11 + $0xc0] sm:$0xff] }
 0xf5a   :  { %3357 = vmatmul.mubr.msk.f32.vlgmr.msra.gmra.mrb[14].mxu0 %vm286_vm12, %v1720_v39  ;;  %v2009_v42 = vmul.f32 %v3817_v33, %v4400_v53  ;;  %v3819_v44 = vpop.eup %3818  ;;  %v3036_v39 = vld [vmem:[%s4617_s11 + $0xc8] sm:$0xff] }
 0xf5b   :  { %3596 = vmatpush3.bf16.msra.mxu0 %v3593_v6  ;;  %3363 = vmatprep.mubr.msk.f32.mxu0 %vm286_vm12, %v1608_v27  ;;  %v2211_v15 = vmul.f32 %v3819_v44, %v4408_v22  ;;  %v3637_v6 = vpack.c.bf16 %v3030_v13, %v3029_v10  ;;  %v3649_v27 = vpack.c.bf16 %v3036_v39, %v3035_v26  ;;  %v3018_v44 = vld [vmem:[%s4614_s8 + $0x1] ss:$0 sm:$0xff]  ;;  %v2693_v13 = vld [vmem:[%s4621_s15 + $0x10] sm:$0xff]  ;;  %s3865_s8 = smov 16  }
 0xf5c   :  { %3604 = vmatprep.subr.bf16.mxu0 %v3603_v28  ;;  %v2691_v10 = vld [vmem:[%s4621_s15] sm:$0xff]  ;;  %v3669_v18 = vpack.c.bf16 %v2694_v14, %v2693_v13 }
 0xf62   :  { %3364 = vmatmul.mubr.msk.f32.vlgmr.msra.gmra.mrb[14].mxu0 %vm286_vm12, %v1609_v38  ;;  %v3039_v38 = vld [vmem:[%s4617_s11 + $0xe0] sm:$0xff] }
 0xf63   :  { %3606 = vmatpush3.bf16.msra.mxu0 %v3603_v28  ;;  %3377 = vmatprep.mubr.msk.f32.mxu0 %vm286_vm12, %v2008_v32  ;;  %v3037_v28 = vld [vmem:[%s4617_s11 + $0xd0] sm:$0xff]  ;;  %v3040_v32 = vld [vmem:[%s4617_s11 + $0xe8] sm:$0xff] }
 0xf64   :  { %v3653_v29 = vpack.c.bf16 %v3038_v17, %v3037_v28  ;;  %v3657_v33 = vpack.c.bf16 %v3040_v32, %v3039_v38  ;;  %v3047_v28 = vld [vmem:[%s4619_s13 + $0x1] ss:$0 sm:$0xff] }
 0xf65   :  { %v3048_v32 = vld [vmem:[%s4620_s14 + $0x1] ss:$0 sm:$0xff] }
 0xf6a   :  { %3378 = vmatmul.mubr.msk.f32.vlgmr.msra.gmra.mrb[14].mxu0 %vm286_vm12, %v2009_v42 }
 0xf80   :  { %v2204_v43 = vpop.xlane.xlu1 %2203 }
 0xf81   :  { %3820 = vrcp.f32 %v2204_v43 }
 0xf84   :  { %v3747_v34 = vpop.permute.xlu1 %3746 }
 0xf85   :  { %v3749_v46 = vunpack.i.h.bf16 %v3747_v34  ;;  %v3748_v47 = vunpack.i.l.bf16 %v3747_v34 }
 0xf87   :  { %v3613_v11 = vpack.c.bf16 %v3749_v46, %v3748_v47 }
 0xf89   :  { %3614 = vmatprep.subr.bf16.mxu0 %v3613_v11 }
 0xf8a   :  { %3616 = vmatpush3.bf16.msra.mxu0 %v3613_v11  ;;  %v3017_v11 = vld [vmem:[%s4613_s7 + $0x1] ss:$0 sm:$0xff] }
 0xf8b   :  { %v3821_v49 = vpop.eup %3820  ;;  %3618 = vmatprep.subr.bf16.mxu0 %v3617_v8 }
 0xf8c   :  { %v2210_v50 = vmul.f32 %v3821_v49, %v4418_v3 }
 0xf8e   :  { %3391 = vmatprep.mubr.msk.f32.mxu0 %vm286_vm12, %v2210_v50 }
 0xf8f   :  { %3392 = vmatmul.mubr.msk.f32.vlgmr.msra.gmra.mrb[14].mxu0 %vm286_vm12, %v2211_v15 }
 0xf90   :  { %3620 = vmatpush3.bf16.msra.mxu0 %v3617_v8 }
 0xf91   :  { %3622 = vmatprep.subr.bf16.mxu0 %v3621_v21 }
 0xf94   :  { %3624 = vmatpush3.bf16.msra.mxu0 %v3621_v21 }
 0xf95   :  { %3634 = vmatprep.subr.bf16.mxu0 %v3633_v12 }
0x1062   :  { %v3393_v51 = vpop.f32.mrb[14].mxu0 }
0x1063   :  { %v2294_v53 = vpop.f32.mrb[15].mxu0 }
0x1064   :  { %3402 = vmatprep.mubr.msk.f32.mxu0 %vm107_vm0, %v2294_v53  ;;  %v3042_v53 = vld [vmem:[%s4617_s11 + $0xf8] sm:$0xff] }
0x1065   :  { %3403 = vmatmul.mubr.msk.f32.vlgmr.msra.gmra.mrb[16].mxu0 %vm107_vm0, %v3393_v51  ;;  %v3041_v51 = vld [vmem:[%s4617_s11 + $0xf0] sm:$0xff] }
0x1066   :  { %3636 = vmatpush3.bf16.msra.mxu0 %v3633_v12  ;;  %v2692_v12 = vld [vmem:[%s4621_s15 + $0x8] sm:$0xff] }
0x1067   :  { %3638 = vmatprep.subr.bf16.mxu0 %v3637_v6 }
0x106a   :  { %3640 = vmatpush3.bf16.msra.mxu0 %v3637_v6  ;;  %v3665_v6 = vpack.c.bf16 %v2692_v12, %v2691_v10 }
0x106b   :  { %3642 = vmatprep.subr.bf16.mxu0 %v3641_v40 }
0x106c   :  { %3666 = vmatprep.subr.bf16.mxu1 %v3665_v6 }
0x106e   :  { %3644 = vmatpush3.bf16.msra.mxu0 %v3641_v40 }
0x106f   :  { %3646 = vmatprep.subr.bf16.mxu0 %v3645_v25 }
0x1072   :  { %3648 = vmatpush3.bf16.msra.mxu0 %v3645_v25 }
0x1073   :  { %3650 = vmatprep.subr.bf16.mxu0 %v3649_v27 }
0x1076   :  { %3652 = vmatpush3.bf16.msra.mxu0 %v3649_v27 }
0x1077   :  { %3654 = vmatprep.subr.bf16.mxu0 %v3653_v29 }
0x107a   :  { %3656 = vmatpush3.bf16.msra.mxu0 %v3653_v29 }
0x107b   :  { %3658 = vmatprep.subr.bf16.mxu0 %v3657_v33 }
0x107e   :  { %3660 = vmatpush3.bf16.msra.mxu0 %v3657_v33 }
0x1138   :  { %v3404_v55 = vpop.f32.mrb[16].mxu0 }
0x1139   :  { %v2396_v56 = vadd.f32 %v3404_v55, %v3012_v54  ;;  %v2390_v57 = vpop.f32.mrb[17].mxu0  ;;  %v3024_v55 = vld [vmem:[%s4616_s10 + $0x1] ss:$0 sm:$0xff]  ;;  %s3866_s10 = smov [#allocation2]  }
0x113a   :  { %v2391_v58 = vadd.f32 %v3012_v54, %v2390_v57  ;;  %v3661_v54 = vpack.c.bf16 %v3042_v53, %v3041_v51  ;;  %s2922_s11 = sshll.u32 %s3866_s10, 4  ;;  %s2923_s11 = int_to_ptr.vmem [resolvable:$true] %s2922_s11 }
0x113b   :  { %v2400_v59 = vadd.f32 %v2396_v56, %v4292_v24  ;;  %p3843_p1 = scmp.lt.s32.totalorder %s2923_s11, %s2923_s11 }
0x113c   :  { %v2399_v30 = vadd.f32 %v2391_v58, %v4290_v20  ;;  %3662 = vmatprep.subr.bf16.mxu0 %v3661_v54 }
0x113d   :  { %v2408_v19 = vsel %vm107_vm0, %v2400_v59, 0.0  ;;  %3664 = vmatpush3.bf16.msra.mxu0 %v3661_v54 }
0x113e   :  { %2409 = vadd.xlane.f32.xlu1 %v2408_v19  ;;  %v2405_v23 = vsel %vm107_vm0, %v2399_v30, 0.0 }
0x113f   :  { %2406 = vadd.xlane.f32.xlu0 %v2405_v23  ;;  %v3044_v23 = vld [vmem:[%s4618_s12 + $0x1] ss:$0 sm:$0xff]  ;;  %s3838_s12 = scalar_lea.vmem %s2923_s11, 256 }
0x1140   :  { %p3839_p0 = scmp.ne.s32.totalorder %s2923_s11, %s3838_s12  ;;  %p3844_p2 = scmp.lt.s32.totalorder %s3838_s12, %s3838_s12 }
0x1142   :  { %p3845_p3 = por %p3844_p2, %p3843_p1 }
0x1144   :  { %p3846_p4 = pnand %p3845_p3, %p3839_p0 }
0x11cb   :  { %v2410_v60 = vpop.xlane.xlu1 %2409 }
0x11cc   :  { %v2412_v22 = vmul.f32 0.03125, %v2410_v60  ;;  %v2407_v16 = vpop.xlane.xlu0 %2406 }
0x11cd   :  { %v2411_v62 = vmul.f32 0.03125, %v2407_v16 }
0x11ce   :  { %v4459_v63 = vsub.f32 %v2400_v59, %v2412_v22 }
0x11cf   :  { %v2413_v0 = vsub.f32 %v2399_v30, %v2411_v62 }
0x11d0   :  { %v2416_v24 = vmul.f32 %v4459_v63, %v4459_v63 }
0x11d1   :  { %v2415_v1 = vmul.f32 %v2413_v0, %v2413_v0 }
0x11d2   :  { %v2420_v20 = vsel %vm107_vm0, %v2416_v24, 0.0 }
0x11d3   :  { %v2417_v3 = vsel %vm107_vm0, %v2415_v1, 0.0 }
0x11d4   :  { %2418 = vadd.xlane.f32.xlu0 %v2417_v3 }
0x11d8   :  { %2421 = vadd.xlane.f32.xlu0 %v2420_v20 }
0x1261   :  { %v2419_v42 = vpop.xlane.xlu0 %2418 }
0x1262   :  { %v2423_v43 = vmul.f32 0.03125, %v2419_v42 }
0x1264   :  { %v2425_v34 = vadd.f32 1e-05, %v2423_v43 }
0x1265   :  { %v2422_v35 = vpop.xlane.xlu0 %2421 }
0x1266   :  { %3822 = vrsqrt.f32 %v2425_v34  ;;  %v2424_v2 = vmul.f32 0.03125, %v2422_v35  ;;  %v2801_v35 = vld [vmem:[%s4623_s17] sm:$0xff] }
0x1268   :  { %v2426_v46 = vadd.f32 1e-05, %v2424_v2  ;;  %v2802_v2 = vld [vmem:[%s4623_s17 + $0x8] sm:$0xff] }
0x126a   :  { %3824 = vrsqrt.f32 %v2426_v46  ;;  %v2803_v46 = vld [vmem:[%s4623_s17 + $0x10] sm:$0xff] }
0x1270   :  { %v3823_v47 = vpop.eup %3822 }
0x1271   :  { %v2429_v8 = vmul.f32 %v3823_v47, %v2413_v0  ;;  %v3673_v47 = vpack.c.bf16 %v2802_v2, %v2801_v35 }
0x1273   :  { %v2437_v52 = vmul.f32 %v3017_v11, %v2429_v8 }
0x1274   :  { %v3825_v48 = vpop.eup %3824 }
0x1275   :  { %v2430_v49 = vmul.f32 %v3825_v48, %v4459_v63  ;;  %v2445_v50 = vadd.f32 %v3018_v44, %v2437_v52 }
0x1277   :  { %v2438_v15 = vmul.f32 %v3017_v11, %v2430_v49  ;;  %3413 = vmatprep.mubr.msk.f32.mxu1 %vm107_vm0, %v2445_v50  ;;  %v2804_v11 = vld [vmem:[%s4623_s17 + $0x18] sm:$0xff] }
0x1278   :  { %v3677_v8 = vpack.c.bf16 %v2804_v11, %v2803_v46 }
0x1279   :  { %v2446_v21 = vadd.f32 %v3018_v44, %v2438_v15  ;;  %v3049_v44 = vld [vmem:[%s4622_s16] ss:$0 sm:$0xff] }
0x127b   :  { %3414 = vmatmul.mubr.msk.f32.vlgmr.msra.gmra.mrb[14].mxu1 %vm107_vm0, %v2446_v21 }
0x127c   :  { %3668 = vmatpush3.bf16.msra.mxu1 %v3665_v6 }
0x127d   :  { %3670 = vmatprep.subr.bf16.mxu1 %v3669_v18 }
0x1280   :  { %3672 = vmatpush3.bf16.msra.mxu1 %v3669_v18 }
0x1281   :  { %3674 = vmatprep.subr.bf16.mxu1 %v3673_v47 }
0x134e   :  { %v3415_v56 = vpop.f32.mrb[14].mxu1 }
0x134f   :  { %v2538_v57 = vadd.f32 %v3415_v56, %v3024_v55  ;;  %v2532_v58 = vpop.f32.mrb[15].mxu1 }
0x1350   :  { %v2533_v59 = vadd.f32 %v3024_v55, %v2532_v58 }
0x1351   :  { %v2542_v19 = vmax.f32 %v2538_v57, 0.0 }
0x1352   :  { %v2541_v30 = vmax.f32 %v2533_v59, 0.0 }
0x1354   :  { %3448 = vmatprep.mubr.f32.mxu0 %v2541_v30 }
0x1355   :  { %3449 = vmatmul.mubr.f32.vlgmr.msra.gmra.mrb[18].mxu0 %v2542_v19 }
0x1428   :  { %v3450_v60 = vpop.f32.mrb[18].mxu0 }
0x1429   :  { %v2640_v22 = vadd.f32 %v3450_v60, %v3044_v23  ;;  %v2634_v16 = vpop.f32.mrb[19].mxu0 }
0x142a   :  { %v2635_v62 = vadd.f32 %v3044_v23, %v2634_v16 }
0x142b   :  { %v2644_v63 = vadd.f32 %v2640_v22, %v2446_v21 }
0x142c   :  { %v2643_v0 = vadd.f32 %v2635_v62, %v2445_v50 }
0x142d   :  { %v2652_v1 = vsel %vm107_vm0, %v2644_v63, 0.0 }
0x142e   :  { %2653 = vadd.xlane.f32.xlu1 %v2652_v1  ;;  %v2649_v3 = vsel %vm107_vm0, %v2643_v0, 0.0 }
0x142f   :  { %2650 = vadd.xlane.f32.xlu0 %v2649_v3 }
0x14bb   :  { %v2654_v24 = vpop.xlane.xlu1 %2653 }
0x14bc   :  { %v2656_v20 = vmul.f32 0.03125, %v2654_v24  ;;  %v2651_v4 = vpop.xlane.xlu0 %2650 }
0x14bd   :  { %v2655_v5 = vmul.f32 0.03125, %v2651_v4 }
0x14be   :  { %v2658_v7 = vsub.f32 %v2644_v63, %v2656_v20 }
0x14bf   :  { %v2657_v9 = vsub.f32 %v2643_v0, %v2655_v5  ;;  %v3052_v0 = vld [vmem:[%s4624_s18] ss:$0 sm:$0xff] }
0x14c0   :  { %v2660_v36 = vmul.f32 %v2658_v7, %v2658_v7 }
0x14c1   :  { %v2659_v37 = vmul.f32 %v2657_v9, %v2657_v9 }
0x14c2   :  { %v2664_v41 = vsel %vm107_vm0, %v2660_v36, 0.0 }
0x14c3   :  { %2665 = vadd.xlane.f32.xlu1 %v2664_v41  ;;  %v2661_v61 = vsel %vm107_vm0, %v2659_v37, 0.0  ;;  %v2900_v37 = vld [vmem:[%s4625_s19 + $0x8] sm:$0xff] }
0x14c4   :  { %2662 = vadd.xlane.f32.xlu0 %v2661_v61  ;;  %v2899_v61 = vld [vmem:[%s4625_s19] sm:$0xff] }
0x1550   :  { %v2666_v40 = vpop.xlane.xlu1 %2665 }
0x1551   :  { %v2668_v31 = vmul.f32 0.03125, %v2666_v40  ;;  %v2663_v45 = vpop.xlane.xlu0 %2662 }
0x1552   :  { %v2667_v25 = vmul.f32 0.03125, %v2663_v45 }
0x1553   :  { %v2670_v26 = vadd.f32 1e-05, %v2668_v31 }
0x1554   :  { %v2669_v39 = vadd.f32 1e-05, %v2667_v25 }
0x1555   :  { %3826 = vrsqrt.f32 %v2670_v26 }
0x1556   :  { %3828 = vrsqrt.f32 %v2669_v39 }
0x155f   :  { %v3827_v27 = vpop.eup %3826 }
0x1560   :  { %v3829_v17 = vpop.eup %3828  ;;  %v2674_v29 = vmul.f32 %v3827_v27, %v2658_v7 }
0x1561   :  { %v2673_v38 = vmul.f32 %v3829_v17, %v2657_v9 }
0x1562   :  { %v2682_v33 = vmul.f32 %v3047_v28, %v2674_v29 }
0x1563   :  { %v2681_v42 = vmul.f32 %v3047_v28, %v2673_v38 }
0x1564   :  { %v2690_v34 = vadd.f32 %v3048_v32, %v2682_v33 }
0x1565   :  { %v2689_v43 = vadd.f32 %v3048_v32, %v2681_v42 }
0x1567   :  { %3459 = vmatprep.mubr.msk.f32.mxu1 %vm107_vm0, %v2689_v43 }
0x1568   :  { %3460 = vmatmul.mubr.msk.f32.vlgmr.msra.gmra.mrb[16].mxu1 %vm107_vm0, %v2690_v34 }
0x1569   :  { %3676 = vmatpush3.bf16.msra.mxu1 %v3673_v47 }
0x156a   :  { %3678 = vmatprep.subr.bf16.mxu1 %v3677_v8 }
0x156d   :  { %3680 = vmatpush3.bf16.msra.mxu1 %v3677_v8 }
0x163b   :  { %v3461_v52 = vpop.f32.mrb[16].mxu1 }
0x163c   :  { %v2780_v48 = vadd.f32 %v3461_v52, %v3049_v44  ;;  %v2774_v49 = vpop.f32.mrb[17].mxu1 }
0x163d   :  { %v2775_v50 = vadd.f32 %v3049_v44, %v2774_v49 }
0x163e   :  { %v2786_v15 = vmul.f32 0.044715, %v2780_v48  ;;  %v2784_v16 = vmul.f32 0.5, %v2780_v48 }
0x163f   :  { %v2785_v21 = vmul.f32 0.044715, %v2775_v50  ;;  %v2783_v60 = vmul.f32 0.5, %v2775_v50 }
0x1640   :  { %v2788_v51 = vmul.f32 %v2786_v15, %v2780_v48 }
0x1641   :  { %v2787_v53 = vmul.f32 %v2785_v21, %v2775_v50 }
0x1642   :  { %v2790_v54 = vmul.f32 %v2788_v51, %v2780_v48 }
0x1643   :  { %v2789_v55 = vmul.f32 %v2787_v53, %v2775_v50 }
0x1644   :  { %v2792_v56 = vadd.f32 %v2790_v54, %v2780_v48 }
0x1645   :  { %v2791_v57 = vadd.f32 %v2789_v55, %v2775_v50 }
0x1646   :  { %v2794_v58 = vmul.f32 0.7978846, %v2792_v56 }
0x1647   :  { %v2793_v59 = vmul.f32 0.7978846, %v2791_v57 }
0x1648   :  { %3830 = vtanh.f32 %v2794_v58 }
0x1649   :  { %3832 = vtanh.f32 %v2793_v59 }
0x1652   :  { %v3831_v30 = vpop.eup %3830 }
0x1653   :  { %v3833_v19 = vpop.eup %3832  ;;  %v2798_v23 = vadd.f32 1.0, %v3831_v30 }
0x1654   :  { %v2797_v22 = vadd.f32 1.0, %v3833_v19 }
0x1655   :  { %v2800_v63 = vmul.f32 %v2798_v23, %v2784_v16 }
0x1656   :  { %v2799_v62 = vmul.f32 %v2797_v22, %v2783_v60 }
0x1658   :  { %3470 = vmatprep.mubr.msk.f32.mxu1 %vm107_vm0, %v2799_v62 }
0x1659   :  { %3471 = vmatmul.mubr.msk.f32.vlgmr.msra.gmra.mrb[18].mxu1 %vm107_vm0, %v2800_v63 }
0x172c   :  { %v3472_v1 = vpop.f32.mrb[18].mxu1 }
0x172d   :  { %v2890_v3 = vadd.f32 %v3472_v1, %v3052_v0  ;;  %v2884_v24 = vpop.f32.mrb[19].mxu1 }
0x172e   :  { %v2885_v20 = vadd.f32 %v3052_v0, %v2884_v24 }
0x172f   :  { %2909 = vrot.lane.b32.xlu1 %v2890_v3, %s3865_s8  ;;  %v2894_v4 = vmul.f32 0.5, %v2890_v3 }
0x1730   :  { %2907 = vrot.lane.b32.xlu0 %v2885_v20, %s3865_s8  ;;  %v2893_v5 = vmul.f32 0.5, %v2885_v20 }
0x1731   :  { %v2897_v7 = vmul.f32 1.442695, %v2894_v4 }
0x1732   :  { %v2895_v9 = vmul.f32 1.442695, %v2893_v5 }
0x1733   :  { %3834 = vpow2.f32 %v2897_v7 }
0x1734   :  { %3836 = vpow2.f32 %v2895_v9 }
0x173d   :  { %v3835_v36 = vpop.eup %3834 }
0x173e   :  { %v3837_v41 = vpop.eup %3836  ;;  %v2902_v10 = vmul.f32 %v3835_v36, %v2900_v37 }
0x173f   :  { %v2901_v12 = vmul.f32 %v3837_v41, %v2899_v61 }
0x1740   :  { %v2904_v13 = vadd.f32 %v2902_v10, %v2890_v3 }
0x1741   :  { %v2903_v6 = vadd.f32 %v2901_v12, %v2885_v20 }
0x17a1   :  { %v2910_v14 = vpop.permute.xlu1 %2909 }
0x17a2   :  { %v2914_v18 = vsel %vm286_vm12, %v2904_v13, %v2910_v14  ;;  %v2908_v40 = vpop.permute.xlu0 %2907 }
0x17a3   :  { %2916 = vst.msk [vmem:[#allocation2 + $0x8] sm:$0xff] %vm107_vm0, %v2914_v18  ;;  %v2913_v31 = vsel %vm286_vm12, %v2903_v6, %v2908_v40 }
0x17a4   :  { %2915 = vst.msk [vmem:[#allocation2] sm:$0xff] %vm107_vm0, %v2913_v31 }
0x17a5   :  { %3849 = shalt.err (!%p3846_p4)
}
0x17a6   :  { %s3850_s28 = scalar_lea.hbm %s4626_s20, 256 }
0x17a7   :  { %p3851_p5 = scmp.ne.s32.totalorder %s4626_s20, %s3850_s28  ;;  %p3854_p6 = scmp.lt.u32.totalorder %s3850_s28, %s4626_s20 }
0x17a9   :  { %p3856_p7 = pnand %p3854_p6, %p3851_p5 }
0x17ab   :  { %3859 = shalt.err (!%p3856_p7)
}
0x17ac   :  { %s3867_s5 = smov 128   ;;  %s3868_s15 = smov 8  }
0x17ad   :  { %2928 = dma.vmem_to_hbm [thread:$0]  %s2923_s11, 256, %s4626_s20, [#allocation3], %s3867_s5, %s3867_s5, %s3868_s15  }
0x17ae   :  { %3860 = dma.done.wait [#allocation3], 256  }
0x17af   :  { %3861 = vsyncadd [#allocation3], 4294967040 }
0x17b0   :  { %2932 = vsyncpa [#allocation3], 1 }

</bundles_post_ra>
